<compile_context>
chip_gen: v7x
topology: tpu7x:2x2x1
jax: 0.10.0
libtpu: 0.0.40
codegen_flags: <defaults>
</compile_context>

<pallas_src>
import jax
import jax.numpy as jnp
from jax.experimental import pallas as pl
from jax.experimental.pallas import tpu as pltpu


def _round_up(x, m):
    return (x + m - 1) // m * m


def _choose_tile(B, tb):
    """Sublane-aligned batch tile: minimize padding for ragged B and prefer
    >= 2 grid steps (so 'parallel' can split across v7x's 2 TensorCores)."""
    b8 = _round_up(B, 8)
    if b8 <= 8:
        return 8
    n_steps = max(2, -(-b8 // tb))            # at least 2 steps when possible
    return _round_up(-(-b8 // n_steps), 8)


def prepare_params(params, *, matmul_dtype=jnp.bfloat16):
    """One-time parameter prep (do this at model-load time, not per call).

    params: w1 (256,1024), b1 (1024,), w2 (1024,512), b2 (512,),
            w3 (512,1),   b3 (1,)   -- PyTorch Linear weights (already
            transposed to x @ W layout).
    """
    return {
        "w1": params["w1"].astype(matmul_dtype),                 # (256, 1024) bf16
        "b1": params["b1"].reshape(1, -1).astype(jnp.float32),   # (1, 1024)
        "w2": params["w2"].astype(matmul_dtype),                 # (1024, 512) bf16
        "b2": params["b2"].reshape(1, -1).astype(jnp.float32),   # (1, 512)
        "w3": params["w3"].reshape(1, -1).astype(jnp.float32),   # (1, 512) f32 row
        "b3": params["b3"].reshape(1, -1).astype(jnp.float32),   # (1, 1)
    }


def _binding_affinity_kernel(com_ref, pro_ref, w1_ref, b1_ref,
                             w2_ref, b2_ref, w3_ref, b3_ref, o_ref, xcat_ref):
    dc = com_ref.shape[1]
    # fc1: fold the concat by writing both halves (cast to bf16) into a VMEM
    # scratch, then a single K=256 matmul that fills the 256-deep MXU.
    xcat_ref[:, :dc] = com_ref[...].astype(xcat_ref.dtype)
    xcat_ref[:, dc:] = pro_ref[...].astype(xcat_ref.dtype)
    h1 = jnp.dot(xcat_ref[...], w1_ref[...],
                 preferred_element_type=jnp.float32)             # bf16 x bf16 -> f32
    h1 = jnp.maximum(h1 + b1_ref[...], 0.0)                      # ReLU (f32 VPU)
    # fc2
    h2 = jnp.dot(h1.astype(w2_ref.dtype), w2_ref[...],
                 preferred_element_type=jnp.float32)
    h2 = jnp.maximum(h2 + b2_ref[...], 0.0)                      # ReLU (f32 VPU)
    # affinity head (512 -> 1): VPU broadcast-multiply + cross-lane reduce
    # instead of a lane-sparse N=1 MXU matmul.
    out = jnp.sum(h2 * w3_ref[...], axis=-1, keepdims=True) + b3_ref[...]
    o_ref[...] = out.astype(o_ref.dtype)
    # TODO(synk): Dropout(p=0.2) is identity in eval mode; training-mode dropout
    # (pltpu.prng_seed / prng_random_bits mask) is not implemented here.


def binding_affinity(com, pro, prep, *, tb=512):
    """Fused forward pass of BindingAffinityLayer.

    com: (B, Dc) f32, pro: (B, Dp) f32 with Dc + Dp == 256.
    prep: output of prepare_params(...).
    Returns (B, 1) f32.
    """
    B, dc = com.shape
    _, dp = pro.shape
    w1, b1 = prep["w1"], prep["b1"]
    w2, b2 = prep["w2"], prep["b2"]
    w3, b3 = prep["w3"], prep["b3"]
    d_in = dc + dp
    assert w1.shape[0] == d_in
    n1 = w1.shape[1]   # 1024
    n2 = w2.shape[1]   # 512

    TB = _choose_tile(B, tb)
    Bp = _round_up(B, TB)
    if Bp != B:
        pad = ((0, Bp - B), (0, 0))
        com = jnp.pad(com, pad)
        pro = jnp.pad(pro, pad)

    out = pl.pallas_call(
        _binding_affinity_kernel,
        out_shape=jax.ShapeDtypeStruct((Bp, 1), jnp.float32),
        grid_spec=pltpu.PrefetchScalarGridSpec(
            num_scalar_prefetch=0,
            grid=(Bp // TB,),
            in_specs=[
                pl.BlockSpec((TB, dc), lambda i: (i, 0)),      # com tile
                pl.BlockSpec((TB, dp), lambda i: (i, 0)),      # pro tile
                pl.BlockSpec((d_in, n1), lambda i: (0, 0)),    # W1 (bf16, resident)
                pl.BlockSpec((1, n1), lambda i: (0, 0)),       # b1
                pl.BlockSpec((n1, n2), lambda i: (0, 0)),      # W2 (bf16, resident)
                pl.BlockSpec((1, n2), lambda i: (0, 0)),       # b2
                pl.BlockSpec((1, n2), lambda i: (0, 0)),       # w3 row (f32)
                pl.BlockSpec((1, 1), lambda i: (0, 0)),        # b3
            ],
            out_specs=pl.BlockSpec((TB, 1), lambda i: (i, 0)),
            scratch_shapes=[pltpu.VMEM((TB, d_in), jnp.bfloat16)],  # fused concat buf
        ),
        compiler_params=pltpu.CompilerParams(
            dimension_semantics=("parallel",),
            vmem_limit_bytes=48 * 1024 * 1024,   # headroom vs v5e's 16 MiB default
        ),
    )(com, pro, w1, b1, w2, b2, w3, b3)

    return out[:B]


def _reference(com, pro, params):
    # Pure-JAX f32 reference of the PyTorch forward (eval mode: dropout = identity).
    x = jnp.concatenate([com, pro], axis=1)
    x = jnp.maximum(x @ params["w1"] + params["b1"], 0.0)
    x = jnp.maximum(x @ params["w2"] + params["b2"], 0.0)
    return x @ params["w3"] + params["b3"]


if __name__ == "__main__":
    key = jax.random.PRNGKey(0)
    B, Dc, Dp = 2, 128, 128          # Dc + Dp == 256 (Linear(256, 1024) input)
    H1, H2 = 1024, 512

    keys = jax.random.split(key, 8)
    com = jax.random.normal(keys[0], (B, Dc), dtype=jnp.float32)
    pro = jax.random.normal(keys[1], (B, Dp), dtype=jnp.float32)
    params = {
        "w1": jax.random.normal(keys[2], (Dc + Dp, H1), jnp.float32) / jnp.sqrt(Dc + Dp),
        "b1": jax.random.normal(keys[3], (H1,), jnp.float32) * 0.01,
        "w2": jax.random.normal(keys[4], (H1, H2), jnp.float32) / jnp.sqrt(H1),
        "b2": jax.random.normal(keys[5], (H2,), jnp.float32) * 0.01,
        "w3": jax.random.normal(keys[6], (H2, 1), jnp.float32) / jnp.sqrt(H2),
        "b3": jax.random.normal(keys[7], (1,), jnp.float32) * 0.01,
    }

    prep = prepare_params(params)            # one-time, load-time param prep
    out = binding_affinity(com, pro, prep)
    out = jax.block_until_ready(out)

    ref = _reference(com, pro, params)
    assert out.shape == (B, 1)
    # bf16 matmul operands with f32 accumulation: relative error ~0.5%.
    assert jnp.allclose(out, ref, atol=2e-2, rtol=2e-2), "mismatch vs reference"

    print("KERNEL_OK")
</pallas_src>

<mosaic_0001>
module attributes {stable_mosaic.version = 11 : i64} {
  func.func @_binding_affinity_kernel(%arg0: i32, %arg1: memref<8x128xf32, #tpu.memory_space<vmem>>, %arg2: memref<8x128xf32, #tpu.memory_space<vmem>>, %arg3: memref<256x1024xbf16, #tpu.memory_space<vmem>>, %arg4: memref<1x1024xf32, #tpu.memory_space<vmem>>, %arg5: memref<1024x512xbf16, #tpu.memory_space<vmem>>, %arg6: memref<1x512xf32, #tpu.memory_space<vmem>>, %arg7: memref<1x512xf32, #tpu.memory_space<vmem>>, %arg8: memref<1x1xf32, #tpu.memory_space<vmem>>, %arg9: memref<8x1xf32, #tpu.memory_space<vmem>>, %arg10: memref<8x256xbf16, #tpu.memory_space<vmem>>) attributes {dimension_semantics = [#tpu.dimension_semantics<parallel>], iteration_bounds = array<i64: 1>, scalar_prefetch = 0 : i64, scratch_operands = 1 : i64, tpu.core_type = #tpu.core_type<tc>, window_params = [{transform_indices = @transform_0, window_bounds = array<i64: 8, 128>}, {transform_indices = @transform_1, window_bounds = array<i64: 8, 128>}, {pipeline_mode = #tpu.pipeline_mode<synchronous>, transform_indices = @transform_2, window_bounds = array<i64: 256, 1024>}, {pipeline_mode = #tpu.pipeline_mode<synchronous>, transform_indices = @transform_3, window_bounds = array<i64: 1, 1024>}, {pipeline_mode = #tpu.pipeline_mode<synchronous>, transform_indices = @transform_4, window_bounds = array<i64: 1024, 512>}, {pipeline_mode = #tpu.pipeline_mode<synchronous>, transform_indices = @transform_5, window_bounds = array<i64: 1, 512>}, {pipeline_mode = #tpu.pipeline_mode<synchronous>, transform_indices = @transform_6, window_bounds = array<i64: 1, 512>}, {pipeline_mode = #tpu.pipeline_mode<synchronous>, transform_indices = @transform_7, window_bounds = array<i64: 1, 1>}, {transform_indices = @transform_8, window_bounds = array<i64: 8, 1>}]} {
    %c0 = arith.constant 0 : index
    %c0_0 = arith.constant 0 : index
    %0 = vector.load %arg1[%c0, %c0_0] : memref<8x128xf32, #tpu.memory_space<vmem>>, vector<8x128xf32>
    %1 = arith.truncf %0 : vector<8x128xf32> to vector<8x128xbf16>
    %c0_1 = arith.constant 0 : index
    %c0_2 = arith.constant 0 : index
    %2 = vector.load %arg10[%c0_1, %c0_2] : memref<8x256xbf16, #tpu.memory_space<vmem>>, vector<8x128xbf16>
    tpu.vector_store %arg10[%c0_1, %c0_2], %1 {strides = array<i32>} : memref<8x256xbf16, #tpu.memory_space<vmem>>, vector<8x128xbf16>,
    %c0_3 = arith.constant 0 : index
    %c0_4 = arith.constant 0 : index
    %3 = vector.load %arg2[%c0_3, %c0_4] : memref<8x128xf32, #tpu.memory_space<vmem>>, vector<8x128xf32>
    %4 = arith.truncf %3 : vector<8x128xf32> to vector<8x128xbf16>
    %c0_5 = arith.constant 0 : index
    %c128 = arith.constant 128 : index
    %5 = vector.load %arg10[%c0_5, %c128] : memref<8x256xbf16, #tpu.memory_space<vmem>>, vector<8x128xbf16>
    tpu.vector_store %arg10[%c0_5, %c128], %4 {strides = array<i32>} : memref<8x256xbf16, #tpu.memory_space<vmem>>, vector<8x128xbf16>,
    %c0_6 = arith.constant 0 : index
    %c0_7 = arith.constant 0 : index
    %6 = vector.load %arg10[%c0_6, %c0_7] : memref<8x256xbf16, #tpu.memory_space<vmem>>, vector<8x256xbf16>
    %c0_8 = arith.constant 0 : index
    %c0_9 = arith.constant 0 : index
    %7 = vector.load %arg3[%c0_8, %c0_9] : memref<256x1024xbf16, #tpu.memory_space<vmem>>, vector<256x1024xbf16>
    %cst = arith.constant dense<0.000000e+00> : vector<8x1024xf32>
    %8 = tpu.matmul %6, %7, %cst {dimension_numbers = #tpu.dot_dimension_numbers<[1], [0], [0], [1], [0, 0, 1, 1], [], []>} : vector<8x256xbf16>, vector<256x1024xbf16>, vector<8x1024xf32> -> vector<8x1024xf32>
    %c0_10 = arith.constant 0 : index
    %c0_11 = arith.constant 0 : index
    %9 = vector.load %arg4[%c0_10, %c0_11] : memref<1x1024xf32, #tpu.memory_space<vmem>>, vector<1x1024xf32>
    %10 = vector.broadcast %9 : vector<1x1024xf32> to vector<8x1024xf32>
    %11 = arith.addf %8, %10 : vector<8x1024xf32>
    %cst_12 = arith.constant 0.000000e+00 : f32
    %12 = vector.broadcast %cst_12 : f32 to vector<8x1024xf32>
    %13 = arith.maximumf %11, %12 : vector<8x1024xf32>
    %14 = arith.truncf %13 : vector<8x1024xf32> to vector<8x1024xbf16>
    %c0_13 = arith.constant 0 : index
    %c0_14 = arith.constant 0 : index
    %15 = vector.load %arg5[%c0_13, %c0_14] : memref<1024x512xbf16, #tpu.memory_space<vmem>>, vector<1024x512xbf16>
    %cst_15 = arith.constant dense<0.000000e+00> : vector<8x512xf32>
    %16 = tpu.matmul %14, %15, %cst_15 {dimension_numbers = #tpu.dot_dimension_numbers<[1], [0], [0], [1], [0, 0, 1, 1], [], []>} : vector<8x1024xbf16>, vector<1024x512xbf16>, vector<8x512xf32> -> vector<8x512xf32>
    %c0_16 = arith.constant 0 : index
    %c0_17 = arith.constant 0 : index
    %17 = vector.load %arg6[%c0_16, %c0_17] : memref<1x512xf32, #tpu.memory_space<vmem>>, vector<1x512xf32>
    %18 = vector.broadcast %17 : vector<1x512xf32> to vector<8x512xf32>
    %19 = arith.addf %16, %18 : vector<8x512xf32>
    %cst_18 = arith.constant 0.000000e+00 : f32
    %20 = vector.broadcast %cst_18 : f32 to vector<8x512xf32>
    %21 = arith.maximumf %19, %20 : vector<8x512xf32>
    %c0_19 = arith.constant 0 : index
    %c0_20 = arith.constant 0 : index
    %22 = vector.load %arg7[%c0_19, %c0_20] : memref<1x512xf32, #tpu.memory_space<vmem>>, vector<1x512xf32>
    %23 = vector.broadcast %22 : vector<1x512xf32> to vector<8x512xf32>
    %24 = arith.mulf %21, %23 : vector<8x512xf32>
    %cst_21 = arith.constant dense<0.000000e+00> : vector<8xf32>
    %25 = vector.multi_reduction <add>, %24, %cst_21 [1] : vector<8x512xf32> to vector<8xf32>
    %26 = vector.shape_cast %25 : vector<8xf32> to vector<8x1xf32>
    %c0_22 = arith.constant 0 : index
    %c0_23 = arith.constant 0 : index
    %27 = vector.load %arg8[%c0_22, %c0_23] : memref<1x1xf32, #tpu.memory_space<vmem>>, vector<1x1xf32>
    %28 = vector.broadcast %27 : vector<1x1xf32> to vector<8x1xf32>
    %29 = arith.addf %26, %28 : vector<8x1xf32>
    %c0_24 = arith.constant 0 : index
    %c0_25 = arith.constant 0 : index
    %30 = vector.load %arg9[%c0_24, %c0_25] : memref<8x1xf32, #tpu.memory_space<vmem>>, vector<8x1xf32>
    tpu.vector_store %arg9[%c0_24, %c0_25], %29 {strides = array<i32>} : memref<8x1xf32, #tpu.memory_space<vmem>>, vector<8x1xf32>,
    return
  }
  func.func @transform_0(%arg0: i32) -> (i32, i32) {
    %c0_i32 = arith.constant 0 : i32
    %c0_i32_0 = arith.constant 0 : i32
    return %arg0, %c0_i32 : i32, i32
  }
  func.func @transform_1(%arg0: i32) -> (i32, i32) {
    %c0_i32 = arith.constant 0 : i32
    %c0_i32_0 = arith.constant 0 : i32
    return %arg0, %c0_i32 : i32, i32
  }
  func.func @transform_2(%arg0: i32) -> (i32, i32) {
    %c0_i32 = arith.constant 0 : i32
    %c0_i32_0 = arith.constant 0 : i32
    %c0_i32_1 = arith.constant 0 : i32
    return %c0_i32, %c0_i32_0 : i32, i32
  }
  func.func @transform_3(%arg0: i32) -> (i32, i32) {
    %c0_i32 = arith.constant 0 : i32
    %c0_i32_0 = arith.constant 0 : i32
    %c0_i32_1 = arith.constant 0 : i32
    return %c0_i32, %c0_i32_0 : i32, i32
  }
  func.func @transform_4(%arg0: i32) -> (i32, i32) {
    %c0_i32 = arith.constant 0 : i32
    %c0_i32_0 = arith.constant 0 : i32
    %c0_i32_1 = arith.constant 0 : i32
    return %c0_i32, %c0_i32_0 : i32, i32
  }
  func.func @transform_5(%arg0: i32) -> (i32, i32) {
    %c0_i32 = arith.constant 0 : i32
    %c0_i32_0 = arith.constant 0 : i32
    %c0_i32_1 = arith.constant 0 : i32
    return %c0_i32, %c0_i32_0 : i32, i32
  }
  func.func @transform_6(%arg0: i32) -> (i32, i32) {
    %c0_i32 = arith.constant 0 : i32
    %c0_i32_0 = arith.constant 0 : i32
    %c0_i32_1 = arith.constant 0 : i32
    return %c0_i32, %c0_i32_0 : i32, i32
  }
  func.func @transform_7(%arg0: i32) -> (i32, i32) {
    %c0_i32 = arith.constant 0 : i32
    %c0_i32_0 = arith.constant 0 : i32
    %c0_i32_1 = arith.constant 0 : i32
    return %c0_i32, %c0_i32_0 : i32, i32
  }
  func.func @transform_8(%arg0: i32) -> (i32, i32) {
    %c0_i32 = arith.constant 0 : i32
    %c0_i32_0 = arith.constant 0 : i32
    return %arg0, %c0_i32 : i32, i32
  }
}

</mosaic_0001>

<bundles_post_ra>
// kernel: tpu_custom_call.1
= control target key start
LH: loop header
LB: loop body
LE: loop exit
PB: predicated region body
PF: predicated region fallthrough
CT: control target
= control target key end

     0   :  { %s4112_s0 = inlined_call_operand.hbm [shape: f32[8,128], index: 0, kind: input, shape index: {}]   ;;  %s4113_s1 = inlined_call_operand.hbm [shape: f32[8,128], index: 1, kind: input, shape index: {}]   ;;  %s4114_s2 = inlined_call_operand.hbm [shape: bf16[256,1024], index: 2, kind: input, shape index: {}]   ;;  %s4115_s3 = inlined_call_operand.vmem [shape: f32[1,1024], index: 3, kind: input, shape index: {}]   ;;  %s4116_s4 = inlined_call_operand.hbm [shape: bf16[1024,512], index: 4, kind: input, shape index: {}]   ;;  %s4117_s5 = inlined_call_operand.vmem [shape: f32[1,512], index: 5, kind: input, shape index: {}]   ;;  %s4118_s6 = inlined_call_operand.vmem [shape: f32[1,512], index: 6, kind: input, shape index: {}]   ;;  %s4119_s7 = inlined_call_operand.<no memory space> [shape: f32[1,1], index: 7, kind: input, shape index: {}]   ;;  %s4120_s8 = inlined_call_operand.vmem [shape: f32[8,1], index: 8, kind: output, shape index: {}]  }
   0x1   :  { %v13_v0 = vstv %s4119_s7 }
   0x2   :  { %14 = vst [vmem:[#allocation3] sm:$0x1] %v13_v0 }
   0x3   :  { %15 = vsyncpa [#allocation5], 0 }
   0x4   :  { %16 = vsyncpa [#allocation7], 0 }
   0x5   :  { %17 = vsyncpa [#allocation10], 0  ;;  %s3932_s29 = smov [#allocation6]   ;;  %s3933_s9 = smov [#allocation4]  }
   0x6   :  { %s34_s30 = sshll.u32 %s3932_s29, 4  ;;  %s24_s10 = sshll.u32 %s3933_s9, 4  ;;  %s35_s30 = int_to_ptr.vmem [resolvable:$true] %s34_s30  ;;  %s25_s10 = int_to_ptr.vmem [resolvable:$true] %s24_s10 }
   0x7   :  { %s3838_s13 = scalar_lea.hbm %s4113_s1, 128 }
   0x8   :  { %p3839_p0 = scmp.ne.s32.totalorder %s4113_s1, %s3838_s13  ;;  %p3842_p1 = scmp.lt.u32.totalorder %s3838_s13, %s4113_s1 }
   0xa   :  { %p3844_p2 = pnand %p3842_p1, %p3839_p0 }
   0xc   :  { %3847 = shalt.err (!%p3844_p2)
}
   0xd   :  { %s3848_s17 = scalar_lea.vmem %s35_s30, 128  ;;  %p3853_p4 = scmp.lt.s32.totalorder %s35_s30, %s35_s30 }
   0xe   :  { %p3849_p3 = scmp.ne.s32.totalorder %s35_s30, %s3848_s17  ;;  %p3854_p5 = scmp.lt.s32.totalorder %s3848_s17, %s3848_s17 }
  0x10   :  { %p3855_p6 = por %p3854_p5, %p3853_p4 }
  0x12   :  { %p3856_p7 = pnand %p3855_p6, %p3849_p3 }
  0x14   :  { %3859 = shalt.err (!%p3856_p7)
}
  0x15   :  { %37 = dma.hbm_to_vmem [thread:$0]  %s4113_s1, 128, %s35_s30, [#allocation7]  }
  0x16   :  { %s3860_s22 = scalar_lea.hbm %s4112_s0, 128 }
  0x17   :  { %p3861_p8 = scmp.ne.s32.totalorder %s4112_s0, %s3860_s22  ;;  %p3864_p9 = scmp.lt.u32.totalorder %s3860_s22, %s4112_s0 }
  0x19   :  { %p3866_p10 = pnand %p3864_p9, %p3861_p8 }
  0x1b   :  { %3869 = shalt.err (!%p3866_p10)
}
  0x1c   :  { %s3870_s27 = scalar_lea.vmem %s25_s10, 128  ;;  %p3875_p12 = scmp.lt.s32.totalorder %s25_s10, %s25_s10 }
  0x1d   :  { %p3871_p11 = scmp.ne.s32.totalorder %s25_s10, %s3870_s27  ;;  %p3876_p13 = scmp.lt.s32.totalorder %s3870_s27, %s3870_s27 }
  0x1f   :  { %p3877_p0 = por %p3876_p13, %p3875_p12 }
  0x21   :  { %p3878_p1 = pnand %p3877_p0, %p3871_p11 }
  0x23   :  { %3881 = shalt.err (!%p3878_p1)
}
  0x24   :  { %27 = dma.hbm_to_vmem [thread:$0]  %s4112_s0, 128, %s25_s10, [#allocation5]  }
  0x25   :  { %s3934_s29 = smov [#allocation8]   ;;  %s3882_s12 = scalar_lea.hbm %s4114_s2, 16384 }
  0x26   :  { %s43_s30 = sshll.u32 %s3934_s29, 4  ;;  %p3883_p2 = scmp.ne.s32.totalorder %s4114_s2, %s3882_s12  ;;  %s44_s30 = int_to_ptr.vmem [resolvable:$true] %s43_s30 }
  0x27   :  { %p3886_p3 = scmp.lt.u32.totalorder %s3882_s12, %s4114_s2 }
  0x29   :  { %p3888_p4 = pnand %p3886_p3, %p3883_p2 }
  0x2b   :  { %3891 = shalt.err (!%p3888_p4)
}
  0x2c   :  { %s3892_s7 = scalar_lea.vmem %s44_s30, 16384  ;;  %p3897_p6 = scmp.lt.s32.totalorder %s44_s30, %s44_s30 }
  0x2d   :  { %p3893_p5 = scmp.ne.s32.totalorder %s44_s30, %s3892_s7  ;;  %p3898_p7 = scmp.lt.s32.totalorder %s3892_s7, %s3892_s7 }
  0x2f   :  { %p3899_p8 = por %p3898_p7, %p3897_p6 }
  0x31   :  { %p3900_p9 = pnand %p3899_p8, %p3893_p5 }
  0x33   :  { %3903 = shalt.err (!%p3900_p9)
}
  0x34   :  { %s3935_s0 = smov 512   ;;  %s3936_s10 = smov 32  }
  0x35   :  { %49 = dma.hbm_to_vmem [thread:$0]  %s4114_s2, 16384, %s44_s30, [#allocation7], %s3935_s0, %s3935_s0, %s3936_s10  }
  0x36   :  { %s3937_s19 = smov [#allocation9]   ;;  %s3904_s23 = scalar_lea.hbm %s4116_s4, 32768 }
  0x37   :  { %s57_s20 = sshll.u32 %s3937_s19, 4  ;;  %p3905_p10 = scmp.ne.s32.totalorder %s4116_s4, %s3904_s23  ;;  %s58_s20 = int_to_ptr.vmem [resolvable:$true] %s57_s20 }
  0x38   :  { %p3908_p11 = scmp.lt.u32.totalorder %s3904_s23, %s4116_s4 }
  0x3a   :  { %p3910_p12 = pnand %p3908_p11, %p3905_p10 }
  0x3c   :  { %3913 = shalt.err (!%p3910_p12)
}
  0x3d   :  { %s3914_s1 = scalar_lea.vmem %s58_s20, 32768  ;;  %p3919_p0 = scmp.lt.s32.totalorder %s58_s20, %s58_s20 }
  0x3e   :  { %p3915_p13 = scmp.ne.s32.totalorder %s58_s20, %s3914_s1  ;;  %p3920_p1 = scmp.lt.s32.totalorder %s3914_s1, %s3914_s1 }
  0x40   :  { %p3921_p2 = por %p3920_p1, %p3919_p0 }
  0x42   :  { %p3922_p3 = pnand %p3921_p2, %p3915_p13 }
  0x44   :  { %3925 = shalt.err (!%p3922_p3)
}
  0x45   :  { %s3938_s2 = smov 256   ;;  %s3939_s28 = smov 16  }
  0x46   :  { %63 = dma.hbm_to_vmem [thread:$0]  %s4116_s4, 32768, %s58_s20, [#allocation10], %s3938_s2, %s3938_s2, %s3939_s28  }
  0x47   :  { %3926 = dma.done.wait [#allocation5], 128  }
  0x48   :  { %3927 = vsyncadd [#allocation5], 4294967168 }
  0x49   :  { %3928 = dma.done.wait [#allocation7], 16512  }
  0x4a   :  { %3929 = vsyncadd [#allocation7], 4294950784 }
  0x4b   :  { %3930 = dma.done.wait [#allocation10], 32768  }
  0x4c   :  { %3931 = vsyncadd [#allocation10], 4294934528  ;;  %v89_v1 = vld [vmem:[#allocation8] sm:$0xff]  ;;  %v90_v18 = vld [vmem:[#allocation8 + $0x8] sm:$0xff]  ;;  %vm3015_vm0 = vcmask 7168  }
  0x4d   :  { %v93_v2 = vld [vmem:[#allocation8 + $0x20] sm:$0xff]  ;;  %v94_v19 = vld [vmem:[#allocation8 + $0x28] sm:$0xff]  ;;  %v85_v20 = vld [vmem:[#allocation6] sm:$0xff] }
  0x4e   :  { %v97_v3 = vld [vmem:[#allocation8 + $0x40] sm:$0xff]  ;;  %v3027_v4 = vcombine.high %v89_v1, %v93_v2  ;;  %v3026_v5 = vcombine.low %v89_v1, %v93_v2  ;;  %v3029_v22 = vcombine.high %v90_v18, %v94_v19  ;;  %v3028_v23 = vcombine.low %v90_v18, %v94_v19  ;;  %v98_v25 = vld [vmem:[#allocation8 + $0x48] sm:$0xff] }
  0x4f   :  { %v101_v6 = vld [vmem:[#allocation8 + $0x60] sm:$0xff]  ;;  %v4036_v24 = vpack.c.bf16 %v85_v20, %v85_v20  ;;  %v102_v26 = vld [vmem:[#allocation8 + $0x68] sm:$0xff] }
  0x50   :  { %v3035_v7 = vcombine.high %v97_v3, %v101_v6  ;;  %v105_v8 = vld [vmem:[#allocation8 + $0x80] sm:$0xff]  ;;  %906 = vmatprep.subr.bf16.mxu0 %v3027_v4  ;;  %v3034_v10 = vcombine.low %v97_v3, %v101_v6  ;;  %v3037_v28 = vcombine.high %v98_v25, %v102_v26  ;;  %v106_v29 = vld [vmem:[#allocation8 + $0x88] sm:$0xff]  ;;  %947 = vmatprep.subr.bf16.mxu1 %v3029_v22 }
  0x51   :  { %v109_v9 = vld [vmem:[#allocation8 + $0xa0] sm:$0xff]  ;;  %907 = vmatpush1.bf16.msra.mxu0 %v3026_v5  ;;  %v110_v30 = vld [vmem:[#allocation8 + $0xa8] sm:$0xff]  ;;  %938 = vmatprep.mubr.bf16.mxu0 %v4036_v24  ;;  %v3036_v33 = vcombine.low %v98_v25, %v102_v26 }
  0x52   :  { %908 = vmatprep.subr.bf16.mxu0 %v3035_v7  ;;  %v3043_v11 = vcombine.high %v105_v8, %v109_v9  ;;  %v113_v12 = vld [vmem:[#allocation8 + $0xc0] sm:$0xff]  ;;  %v3042_v14 = vcombine.low %v105_v8, %v109_v9  ;;  %948 = vmatpush1.bf16.msra.mxu1 %v3028_v23  ;;  %v3045_v35 = vcombine.high %v106_v29, %v110_v30  ;;  %v114_v37 = vld [vmem:[#allocation8 + $0xc8] sm:$0xff] }
  0x53   :  { %v117_v13 = vld [vmem:[#allocation8 + $0xe0] sm:$0xff]  ;;  %979 = vmatprep.mubr.bf16.mxu1 %v4036_v24  ;;  %949 = vmatprep.subr.bf16.mxu1 %v3037_v28  ;;  %v118_v38 = vld [vmem:[#allocation8 + $0xe8] sm:$0xff]  ;;  %v3044_v41 = vcombine.low %v106_v29, %v110_v30 }
  0x54   :  { %v3051_v15 = vcombine.high %v113_v12, %v117_v13  ;;  %v121_v16 = vld [vmem:[#allocation8 + $0x100] sm:$0xff]  ;;  %v3050_v21 = vcombine.low %v113_v12, %v117_v13  ;;  %v3053_v43 = vcombine.high %v114_v37, %v118_v38  ;;  %v122_v45 = vld [vmem:[#allocation8 + $0x108] sm:$0xff]  ;;  %v3052_v49 = vcombine.low %v114_v37, %v118_v38 }
  0x55   :  { %909 = vmatpush1.bf16.msra.mxu0 %v3034_v10  ;;  %v125_v17 = vld [vmem:[#allocation8 + $0x120] sm:$0xff]  ;;  %v126_v46 = vld [vmem:[#allocation8 + $0x128] sm:$0xff] }
  0x56   :  { %910 = vmatprep.subr.bf16.mxu0 %v3043_v11  ;;  %v3059_v27 = vcombine.high %v121_v16, %v125_v17  ;;  %v129_v31 = vld [vmem:[#allocation8 + $0x140] sm:$0xff]  ;;  %v3058_v34 = vcombine.low %v121_v16, %v125_v17  ;;  %950 = vmatpush1.bf16.msra.mxu1 %v3036_v33  ;;  %v3061_v51 = vcombine.high %v122_v45, %v126_v46  ;;  %v130_v53 = vld [vmem:[#allocation8 + $0x148] sm:$0xff] }
  0x57   :  { %v133_v32 = vld [vmem:[#allocation8 + $0x160] sm:$0xff]  ;;  %951 = vmatprep.subr.bf16.mxu1 %v3045_v35  ;;  %v134_v54 = vld [vmem:[#allocation8 + $0x168] sm:$0xff]  ;;  %v3060_v57 = vcombine.low %v122_v45, %v126_v46 }
  0x58   :  { %v3067_v36 = vcombine.high %v129_v31, %v133_v32  ;;  %v137_v39 = vld [vmem:[#allocation8 + $0x180] sm:$0xff]  ;;  %v3066_v42 = vcombine.low %v129_v31, %v133_v32  ;;  %v3069_v59 = vcombine.high %v130_v53, %v134_v54  ;;  %v138_v61 = vld [vmem:[#allocation8 + $0x188] sm:$0xff]  ;;  %v3068_v1 = vcombine.low %v130_v53, %v134_v54 }
  0x59   :  { %911 = vmatpush1.bf16.msra.mxu0 %v3042_v14  ;;  %v141_v40 = vld [vmem:[#allocation8 + $0x1a0] sm:$0xff]  ;;  %v142_v62 = vld [vmem:[#allocation8 + $0x1a8] sm:$0xff] }
  0x5a   :  { %912 = vmatprep.subr.bf16.mxu0 %v3051_v15  ;;  %v3075_v44 = vcombine.high %v137_v39, %v141_v40  ;;  %v145_v47 = vld [vmem:[#allocation8 + $0x1c0] sm:$0xff]  ;;  %952 = vmatpush1.bf16.msra.mxu1 %v3044_v41  ;;  %v3074_v50 = vcombine.low %v137_v39, %v141_v40  ;;  %v3077_v3 = vcombine.high %v138_v61, %v142_v62  ;;  %v146_v5 = vld [vmem:[#allocation8 + $0x1c8] sm:$0xff] }
  0x5b   :  { %v149_v48 = vld [vmem:[#allocation8 + $0x1e0] sm:$0xff]  ;;  %953 = vmatprep.subr.bf16.mxu1 %v3053_v43  ;;  %v150_v6 = vld [vmem:[#allocation8 + $0x1e8] sm:$0xff]  ;;  %v3076_v9 = vcombine.low %v138_v61, %v142_v62 }
  0x5c   :  { %v3083_v52 = vcombine.high %v145_v47, %v149_v48  ;;  %v153_v55 = vld [vmem:[#allocation8 + $0x200] sm:$0xff]  ;;  %v3082_v58 = vcombine.low %v145_v47, %v149_v48  ;;  %v3085_v11 = vcombine.high %v146_v5, %v150_v6  ;;  %v154_v13 = vld [vmem:[#allocation8 + $0x208] sm:$0xff]  ;;  %v3084_v17 = vcombine.low %v146_v5, %v150_v6 }
  0x5d   :  { %913 = vmatpush1.bf16.msra.mxu0 %v3050_v21  ;;  %v157_v56 = vld [vmem:[#allocation8 + $0x220] sm:$0xff]  ;;  %v158_v14 = vld [vmem:[#allocation8 + $0x228] sm:$0xff] }
  0x5e   :  { %914 = vmatprep.subr.bf16.mxu0 %v3059_v27  ;;  %954 = vmatpush1.bf16.msra.mxu1 %v3052_v49  ;;  %v3091_v60 = vcombine.high %v153_v55, %v157_v56  ;;  %v161_v63 = vld [vmem:[#allocation8 + $0x240] sm:$0xff]  ;;  %v3090_v2 = vcombine.low %v153_v55, %v157_v56  ;;  %v3093_v19 = vcombine.high %v154_v13, %v158_v14  ;;  %v162_v21 = vld [vmem:[#allocation8 + $0x248] sm:$0xff]  ;;  %v91_v56 = vld [vmem:[#allocation8 + $0x10] sm:$0xff] }
  0x5f   :  { %955 = vmatprep.subr.bf16.mxu1 %v3061_v51  ;;  %v165_v0 = vld [vmem:[#allocation8 + $0x260] sm:$0xff]  ;;  %v166_v22 = vld [vmem:[#allocation8 + $0x268] sm:$0xff]  ;;  %v3092_v26 = vcombine.low %v154_v13, %v158_v14 }
  0x60   :  { %v3099_v4 = vcombine.high %v161_v63, %v165_v0  ;;  %v169_v7 = vld [vmem:[#allocation8 + $0x280] sm:$0xff]  ;;  %v3098_v10 = vcombine.low %v161_v63, %v165_v0  ;;  %v3101_v29 = vcombine.high %v162_v21, %v166_v22  ;;  %v170_v31 = vld [vmem:[#allocation8 + $0x288] sm:$0xff] }
  0x61   :  { %915 = vmatpush1.bf16.msra.mxu0 %v3058_v34  ;;  %v173_v8 = vld [vmem:[#allocation8 + $0x2a0] sm:$0xff]  ;;  %v174_v32 = vld [vmem:[#allocation8 + $0x2a8] sm:$0xff]  ;;  %v3100_v34 = vcombine.low %v162_v21, %v166_v22  ;;  %v123_v22 = vld [vmem:[#allocation8 + $0x110] sm:$0xff] }
  0x62   :  { %916 = vmatprep.subr.bf16.mxu0 %v3067_v36  ;;  %956 = vmatpush1.bf16.msra.mxu1 %v3060_v57  ;;  %v3107_v12 = vcombine.high %v169_v7, %v173_v8  ;;  %v177_v15 = vld [vmem:[#allocation8 + $0x2c0] sm:$0xff]  ;;  %v3106_v18 = vcombine.low %v169_v7, %v173_v8  ;;  %v3109_v37 = vcombine.high %v170_v31, %v174_v32  ;;  %v178_v39 = vld [vmem:[#allocation8 + $0x2c8] sm:$0xff]  ;;  %v95_v57 = vld [vmem:[#allocation8 + $0x30] sm:$0xff] }
  0x63   :  { %957 = vmatprep.subr.bf16.mxu1 %v3069_v59  ;;  %v181_v16 = vld [vmem:[#allocation8 + $0x2e0] sm:$0xff]  ;;  %v182_v40 = vld [vmem:[#allocation8 + $0x2e8] sm:$0xff]  ;;  %v3031_v0 = vcombine.high %v91_v56, %v95_v57  ;;  %v3030_v7 = vcombine.low %v91_v56, %v95_v57  ;;  %v155_v56 = vld [vmem:[#allocation8 + $0x210] sm:$0xff] }
  0x64   :  { %v3115_v20 = vcombine.high %v177_v15, %v181_v16  ;;  %v185_v23 = vld [vmem:[#allocation8 + $0x300] sm:$0xff]  ;;  %v3114_v27 = vcombine.low %v177_v15, %v181_v16  ;;  %v3117_v45 = vcombine.high %v178_v39, %v182_v40  ;;  %v186_v47 = vld [vmem:[#allocation8 + $0x308] sm:$0xff]  ;;  %v115_v15 = vld [vmem:[#allocation8 + $0xd0] sm:$0xff] }
  0x65   :  { %917 = vmatpush1.bf16.msra.mxu0 %v3066_v42  ;;  %v189_v25 = vld [vmem:[#allocation8 + $0x320] sm:$0xff]  ;;  %v3108_v42 = vcombine.low %v170_v31, %v174_v32  ;;  %v190_v48 = vld [vmem:[#allocation8 + $0x328] sm:$0xff]  ;;  %v131_v31 = vld [vmem:[#allocation8 + $0x150] sm:$0xff] }
  0x66   :  { %918 = vmatprep.subr.bf16.mxu0 %v3075_v44  ;;  %958 = vmatpush1.bf16.msra.mxu1 %v3068_v1  ;;  %v193_v28 = vld [vmem:[#allocation8 + $0x340] sm:$0xff]  ;;  %v3123_v30 = vcombine.high %v185_v23, %v189_v25  ;;  %v3122_v35 = vcombine.low %v185_v23, %v189_v25  ;;  %v194_v53 = vld [vmem:[#allocation8 + $0x348] sm:$0xff]  ;;  %v99_v1 = vld [vmem:[#allocation8 + $0x50] sm:$0xff] }
  0x67   :  { %959 = vmatprep.subr.bf16.mxu1 %v3077_v3  ;;  %v197_v33 = vld [vmem:[#allocation8 + $0x360] sm:$0xff]  ;;  %v198_v55 = vld [vmem:[#allocation8 + $0x368] sm:$0xff]  ;;  %v159_v57 = vld [vmem:[#allocation8 + $0x230] sm:$0xff] }
  0x68   :  { %v201_v36 = vld [vmem:[#allocation8 + $0x380] sm:$0xff]  ;;  %v3131_v38 = vcombine.high %v193_v28, %v197_v33  ;;  %v3130_v43 = vcombine.low %v193_v28, %v197_v33  ;;  %v3133_v61 = vcombine.high %v194_v53, %v198_v55  ;;  %v202_v62 = vld [vmem:[#allocation8 + $0x388] sm:$0xff]  ;;  %v127_v28 = vld [vmem:[#allocation8 + $0x130] sm:$0xff] }
  0x69   :  { %919 = vmatpush1.bf16.msra.mxu0 %v3074_v50  ;;  %v205_v41 = vld [vmem:[#allocation8 + $0x3a0] sm:$0xff]  ;;  %v3116_v50 = vcombine.low %v178_v39, %v182_v40  ;;  %v206_v63 = vld [vmem:[#allocation8 + $0x3a8] sm:$0xff]  ;;  %v3063_v33 = vcombine.high %v123_v22, %v127_v28  ;;  %v139_v39 = vld [vmem:[#allocation8 + $0x190] sm:$0xff] }
  0x6a   :  { %920 = vmatprep.subr.bf16.mxu0 %v3083_v52  ;;  %960 = vmatpush1.bf16.msra.mxu1 %v3076_v9  ;;  %v209_v44 = vld [vmem:[#allocation8 + $0x3c0] sm:$0xff]  ;;  %v3139_v46 = vcombine.high %v201_v36, %v205_v41  ;;  %v3138_v51 = vcombine.low %v201_v36, %v205_v41  ;;  %v3125_v52 = vcombine.high %v186_v47, %v190_v48  ;;  %v210_v6 = vld [vmem:[#allocation8 + $0x3c8] sm:$0xff]  ;;  %v135_v36 = vld [vmem:[#allocation8 + $0x170] sm:$0xff] }
  0x6b   :  { %961 = vmatprep.subr.bf16.mxu1 %v3085_v11  ;;  %v213_v49 = vld [vmem:[#allocation8 + $0x3e0] sm:$0xff]  ;;  %v3141_v5 = vcombine.high %v202_v62, %v206_v63  ;;  %v214_v8 = vld [vmem:[#allocation8 + $0x3e8] sm:$0xff]  ;;  %v111_v11 = vld [vmem:[#allocation8 + $0xb0] sm:$0xff] }
  0x6c   :  { %v3147_v54 = vcombine.high %v209_v44, %v213_v49  ;;  %v3146_v59 = vcombine.low %v209_v44, %v213_v49  ;;  %v3149_v13 = vcombine.high %v210_v6, %v214_v8  ;;  %v143_v40 = vld [vmem:[#allocation8 + $0x1b0] sm:$0xff]  ;;  %v3071_v44 = vcombine.high %v131_v31, %v135_v36 }
  0x6d   :  { %921 = vmatpush1.bf16.msra.mxu0 %v3082_v58  ;;  %v3124_v58 = vcombine.low %v186_v47, %v190_v48  ;;  %v128_v47 = vld [vmem:[#allocation8 + $0x138] sm:$0xff]  ;;  %v3070_v48 = vcombine.low %v131_v31, %v135_v36  ;;  %v147_v49 = vld [vmem:[#allocation8 + $0x1d0] sm:$0xff] }
  0x6e   :  { %922 = vmatprep.subr.bf16.mxu0 %v3091_v60  ;;  %962 = vmatpush1.bf16.msra.mxu1 %v3084_v17  ;;  %v82_v60 = vld [vmem:[#allocation4] sm:$0xff]  ;;  %v92_v17 = vld [vmem:[#allocation8 + $0x18] sm:$0xff] }
  0x6f   :  { %963 = vmatprep.subr.bf16.mxu1 %v3093_v19  ;;  %v4040_v3 = vpack.c.bf16 %v82_v60, %v82_v60  ;;  %v119_v19 = vld [vmem:[#allocation8 + $0xf0] sm:$0xff]  ;;  %v172_v31 = vld [vmem:[#allocation8 + $0x298] sm:$0xff] }
  0x70   :  { %v3055_v25 = vcombine.high %v115_v15, %v119_v19 }
  0x71   :  { %923 = vmatpush1.bf16.msra.mxu0 %v3090_v2  ;;  %v103_v2 = vld [vmem:[#allocation8 + $0x70] sm:$0xff] }
  0x72   :  { %924 = vmatprep.subr.bf16.mxu0 %v3099_v4  ;;  %964 = vmatpush1.bf16.msra.mxu1 %v3092_v26  ;;  %v3132_v4 = vcombine.low %v194_v53, %v198_v55  ;;  %v3039_v9 = vcombine.high %v99_v1, %v103_v2  ;;  %v3038_v14 = vcombine.low %v99_v1, %v103_v2  ;;  %v100_v26 = vld [vmem:[#allocation8 + $0x58] sm:$0xff]  ;;  %v167_v1 = vld [vmem:[#allocation8 + $0x270] sm:$0xff] }
  0x73   :  { %965 = vmatprep.subr.bf16.mxu1 %v3101_v29  ;;  %v132_v53 = vld [vmem:[#allocation8 + $0x158] sm:$0xff]  ;;  %v3078_v55 = vcombine.low %v139_v39, %v143_v40 }
  0x75   :  { %925 = vmatpush1.bf16.msra.mxu0 %v3098_v10  ;;  %v107_v10 = vld [vmem:[#allocation8 + $0x90] sm:$0xff] }
  0x76   :  { %926 = vmatprep.subr.bf16.mxu0 %v3107_v12  ;;  %966 = vmatpush1.bf16.msra.mxu1 %v3100_v34  ;;  %v3140_v12 = vcombine.low %v202_v62, %v206_v63  ;;  %v3047_v16 = vcombine.high %v107_v10, %v111_v11  ;;  %v3046_v21 = vcombine.low %v107_v10, %v111_v11  ;;  %v108_v34 = vld [vmem:[#allocation8 + $0x98] sm:$0xff]  ;;  %v175_v10 = vld [vmem:[#allocation8 + $0x2b0] sm:$0xff] }
  0x77   :  { %967 = vmatprep.subr.bf16.mxu1 %v3109_v37  ;;  %v144_v62 = vld [vmem:[#allocation8 + $0x1b8] sm:$0xff] }
  0x79   :  { %927 = vmatpush1.bf16.msra.mxu0 %v3106_v18  ;;  %v96_v18 = vld [vmem:[#allocation8 + $0x38] sm:$0xff] }
  0x7a   :  { %928 = vmatprep.subr.bf16.mxu0 %v3115_v20  ;;  %968 = vmatpush1.bf16.msra.mxu1 %v3108_v42  ;;  %v3148_v20 = vcombine.low %v210_v6, %v214_v8  ;;  %v3033_v23 = vcombine.high %v92_v17, %v96_v18  ;;  %v3032_v29 = vcombine.low %v92_v17, %v96_v18  ;;  %v116_v42 = vld [vmem:[#allocation8 + $0xd8] sm:$0xff]  ;;  %v179_v17 = vld [vmem:[#allocation8 + $0x2d0] sm:$0xff] }
  0x7b   :  { %969 = vmatprep.subr.bf16.mxu1 %v3117_v45  ;;  %v148_v6 = vld [vmem:[#allocation8 + $0x1d8] sm:$0xff]  ;;  %v3094_v8 = vcombine.low %v155_v56, %v159_v57  ;;  %v183_v18 = vld [vmem:[#allocation8 + $0x2f0] sm:$0xff] }
  0x7d   :  { %929 = vmatpush1.bf16.msra.mxu0 %v3114_v27  ;;  %v104_v27 = vld [vmem:[#allocation8 + $0x78] sm:$0xff] }
  0x7e   :  { %930 = vmatprep.subr.bf16.mxu0 %v3123_v30  ;;  %970 = vmatpush1.bf16.msra.mxu1 %v3116_v50  ;;  %v3054_v30 = vcombine.low %v115_v15, %v119_v19  ;;  %v3041_v32 = vcombine.high %v100_v26, %v104_v27  ;;  %v3040_v37 = vcombine.low %v100_v26, %v104_v27  ;;  %v151_v50 = vld [vmem:[#allocation8 + $0x1f0] sm:$0xff]  ;;  %v160_v15 = vld [vmem:[#allocation8 + $0x238] sm:$0xff] }
  0x7f   :  { %971 = vmatprep.subr.bf16.mxu1 %v3125_v52  ;;  %v3086_v63 = vcombine.low %v147_v49, %v151_v50  ;;  %v187_v26 = vld [vmem:[#allocation8 + $0x310] sm:$0xff] }
  0x80   :  { %v191_v27 = vld [vmem:[#allocation8 + $0x330] sm:$0xff] }
  0x81   :  { %931 = vmatpush1.bf16.msra.mxu0 %v3122_v35  ;;  %v112_v35 = vld [vmem:[#allocation8 + $0xb8] sm:$0xff] }
  0x82   :  { %932 = vmatprep.subr.bf16.mxu0 %v3131_v38  ;;  %972 = vmatpush1.bf16.msra.mxu1 %v3124_v58  ;;  %v3062_v38 = vcombine.low %v123_v22, %v127_v28  ;;  %v3049_v41 = vcombine.high %v108_v34, %v112_v35  ;;  %v3048_v45 = vcombine.low %v108_v34, %v112_v35  ;;  %v164_v22 = vld [vmem:[#allocation8 + $0x258] sm:$0xff]  ;;  %v195_v34 = vld [vmem:[#allocation8 + $0x350] sm:$0xff] }
  0x83   :  { %973 = vmatprep.subr.bf16.mxu1 %v3133_v61  ;;  %v140_v61 = vld [vmem:[#allocation8 + $0x198] sm:$0xff]  ;;  %v199_v35 = vld [vmem:[#allocation8 + $0x370] sm:$0xff] }
  0x84   :  { %v3081_v11 = vcombine.high %v140_v61, %v144_v62 }
  0x85   :  { %933 = vmatpush1.bf16.msra.mxu0 %v3130_v43  ;;  %v120_v43 = vld [vmem:[#allocation8 + $0xf8] sm:$0xff] }
  0x86   :  { %934 = vmatprep.subr.bf16.mxu0 %v3139_v46  ;;  %974 = vmatpush1.bf16.msra.mxu1 %v3132_v4  ;;  %v124_v46 = vld [vmem:[#allocation8 + $0x118] sm:$0xff]  ;;  %v3056_v52 = vcombine.low %v116_v42, %v120_v43  ;;  %v3095_v4 = vcombine.high %v155_v56, %v159_v57 }
  0x87   :  { %975 = vmatprep.subr.bf16.mxu1 %v3141_v5  ;;  %v3065_v58 = vcombine.high %v124_v46, %v128_v47  ;;  %v3064_v60 = vcombine.low %v124_v46, %v128_v47  ;;  %v188_v47 = vld [vmem:[#allocation8 + $0x318] sm:$0xff] }
  0x89   :  { %935 = vmatpush1.bf16.msra.mxu0 %v3138_v51  ;;  %v3079_v51 = vcombine.high %v139_v39, %v143_v40  ;;  %v180_v39 = vld [vmem:[#allocation8 + $0x2d8] sm:$0xff] }
  0x8a   :  { %936 = vmatprep.subr.bf16.mxu0 %v3147_v54  ;;  %976 = vmatpush1.bf16.msra.mxu1 %v3140_v12  ;;  %v136_v54 = vld [vmem:[#allocation8 + $0x178] sm:$0xff] }
  0x8b   :  { %977 = vmatprep.subr.bf16.mxu1 %v3149_v13  ;;  %v3073_v2 = vcombine.high %v132_v53, %v136_v54  ;;  %v3072_v5 = vcombine.low %v132_v53, %v136_v54  ;;  %v3080_v13 = vcombine.low %v140_v61, %v144_v62  ;;  %v184_v40 = vld [vmem:[#allocation8 + $0x2f8] sm:$0xff]  ;;  %v3456_v62 = vld [vmem:[#allocation9 + $0x4] ss:$16 sps:$4 sm:$0xff]  }
  0x8c   :  { %v3120_v53 = vcombine.low %v180_v39, %v184_v40  ;;  %v196_v54 = vld [vmem:[#allocation8 + $0x358] sm:$0xff] }
  0x8d   :  { %937 = vmatpush1.bf16.msra.mxu0 %v3146_v59  ;;  %v3087_v59 = vcombine.high %v147_v49, %v151_v50  ;;  %v3134_v49 = vcombine.low %v195_v34, %v199_v35  ;;  %v211_v50 = vld [vmem:[#allocation8 + $0x3d0] sm:$0xff]  ;;  %v208_v61 = vld [vmem:[#allocation8 + $0x3b8] sm:$0xff] }
  0x8e   :  { %988 = vmatprep.subr.bf16.mxu0 %v3031_v0  ;;  %978 = vmatpush1.bf16.msra.mxu1 %v3148_v20  ;;  %v163_v0 = vld [vmem:[#allocation8 + $0x250] sm:$0xff] }
  0x8f   :  { %1029 = vmatprep.subr.bf16.mxu1 %v3033_v23  ;;  %v3103_v12 = vcombine.high %v163_v0, %v167_v1  ;;  %v168_v23 = vld [vmem:[#allocation8 + $0x278] sm:$0xff] }
  0x90   :  { %939 = vmatmul.mubr.bf16.vlgmr.msra.gmra.mrb[0].mxu0 %v4040_v3  ;;  %v3105_v36 = vcombine.high %v164_v22, %v168_v23 }
  0x91   :  { %989 = vmatpush1.bf16.msra.mxu0 %v3030_v7  ;;  %1020 = vmatprep.mubr.bf16.mxu0 %v4036_v24  ;;  %v152_v7 = vld [vmem:[#allocation8 + $0x1f8] sm:$0xff] }
  0x92   :  { %990 = vmatprep.subr.bf16.mxu0 %v3039_v9  ;;  %980 = vmatmul.mubr.bf16.vlgmr.msra.gmra.mrb[0].mxu1 %v4040_v3  ;;  %v171_v9 = vld [vmem:[#allocation8 + $0x290] sm:$0xff]  ;;  %v3089_v19 = vcombine.high %v148_v6, %v152_v7 }
  0x93   :  { %1030 = vmatpush1.bf16.msra.mxu1 %v3032_v29  ;;  %1061 = vmatprep.mubr.bf16.mxu1 %v4036_v24  ;;  %v3057_v24 = vcombine.high %v116_v42, %v120_v43  ;;  %v3111_v20 = vcombine.high %v171_v9, %v175_v10  ;;  %v3119_v29 = vcombine.high %v179_v17, %v183_v18  ;;  %v203_v42 = vld [vmem:[#allocation8 + $0x390] sm:$0xff] }
  0x94   :  { %1031 = vmatprep.subr.bf16.mxu1 %v3041_v32  ;;  %v176_v32 = vld [vmem:[#allocation8 + $0x2b8] sm:$0xff]  ;;  %v207_v43 = vld [vmem:[#allocation8 + $0x3b0] sm:$0xff] }
  0x95   :  { %991 = vmatpush1.bf16.msra.mxu0 %v3038_v14  ;;  %v156_v14 = vld [vmem:[#allocation8 + $0x218] sm:$0xff]  ;;  %v3112_v46 = vcombine.low %v172_v31, %v176_v32  ;;  %v3142_v56 = vcombine.low %v203_v42, %v207_v43 }
  0x96   :  { %992 = vmatprep.subr.bf16.mxu0 %v3047_v16  ;;  %v3102_v16 = vcombine.low %v163_v0, %v167_v1  ;;  %v3097_v28 = vcombine.high %v156_v14, %v160_v15  ;;  %v3454_v1 = vld [vmem:[#allocation9] ss:$16 sps:$4 sm:$0xff]  }
  0x97   :  { %1032 = vmatpush1.bf16.msra.mxu1 %v3040_v37  ;;  %v3127_v37 = vcombine.high %v187_v26, %v191_v27 }
  0x98   :  { %1033 = vmatprep.subr.bf16.mxu1 %v3049_v41  ;;  %v3126_v41 = vcombine.low %v187_v26, %v191_v27  ;;  %v3477_v26 = vld [vmem:[#allocation9 + $0x6c] ss:$16 sps:$4 sm:$0xff]   ;;  %v3484_v27 = vld [vmem:[#allocation9 + $0xa0] ss:$16 sps:$4 sm:$0xff]  }
  0x99   :  { %993 = vmatpush1.bf16.msra.mxu0 %v3046_v21  ;;  %v3088_v21 = vcombine.low %v148_v6, %v152_v7  ;;  %v3462_v6 = vld [vmem:[#allocation9 + $0x24] ss:$16 sps:$4 sm:$0xff]  }
  0x9a   :  { %994 = vmatprep.subr.bf16.mxu0 %v3055_v25  ;;  %v3110_v25 = vcombine.low %v171_v9, %v175_v10  ;;  %v3468_v10 = vld [vmem:[#allocation9 + $0x44] ss:$16 sps:$4 sm:$0xff]  }
  0x9b   :  { %1034 = vmatpush1.bf16.msra.mxu1 %v3048_v45  ;;  %v3135_v45 = vcombine.high %v195_v34, %v199_v35  ;;  %v3496_v34 = vld [vmem:[#allocation9 + $0xe0] ss:$16 sps:$4 sm:$0xff]   ;;  %v3504_v35 = vld [vmem:[#allocation9 + $0x104] ss:$16 sps:$4 sm:$0xff]  }
  0x9c   :  { %1035 = vmatprep.subr.bf16.mxu1 %v3057_v24  ;;  %v215_v24 = vld [vmem:[#allocation8 + $0x3f0] sm:$0xff] }
  0x9d   :  { %995 = vmatpush1.bf16.msra.mxu0 %v3054_v30  ;;  %v3096_v30 = vcombine.low %v156_v14, %v160_v15  ;;  %v3474_v15 = vld [vmem:[#allocation9 + $0x64] ss:$16 sps:$4 sm:$0xff]  }
  0x9e   :  { %996 = vmatprep.subr.bf16.mxu0 %v3063_v33  ;;  %v3118_v33 = vcombine.low %v179_v17, %v183_v18  ;;  %v3465_v17 = vld [vmem:[#allocation9 + $0x2c] ss:$16 sps:$4 sm:$0xff]   ;;  %v3472_v18 = vld [vmem:[#allocation9 + $0x60] ss:$16 sps:$4 sm:$0xff]  }
  0x9f   :  { %1036 = vmatpush1.bf16.msra.mxu1 %v3056_v52  ;;  %v3143_v52 = vcombine.high %v203_v42, %v207_v43  ;;  %v3508_v42 = vld [vmem:[#allocation9 + $0x120] ss:$16 sps:$4 sm:$0xff]   ;;  %v3516_v43 = vld [vmem:[#allocation9 + $0x144] ss:$16 sps:$4 sm:$0xff]  }
  0xa0   :  { %1037 = vmatprep.subr.bf16.mxu1 %v3065_v58  ;;  %v3151_v58 = vcombine.high %v211_v50, %v215_v24 }
  0xa1   :  { %997 = vmatpush1.bf16.msra.mxu0 %v3062_v38  ;;  %v3104_v38 = vcombine.low %v164_v22, %v168_v23  ;;  %v3478_v22 = vld [vmem:[#allocation9 + $0x80] ss:$16 sps:$4 sm:$0xff]   ;;  %v3486_v23 = vld [vmem:[#allocation9 + $0xa4] ss:$16 sps:$4 sm:$0xff]  }
  0xa2   :  { %998 = vmatprep.subr.bf16.mxu0 %v3071_v44  ;;  %v3113_v44 = vcombine.high %v172_v31, %v176_v32  ;;  %v3498_v31 = vld [vmem:[#allocation9 + $0xe4] ss:$16 sps:$4 sm:$0xff]   ;;  %v3481_v32 = vld [vmem:[#allocation9 + $0x88] ss:$16 sps:$4 sm:$0xff]  }
  0xa3   :  { %1038 = vmatpush1.bf16.msra.mxu1 %v3064_v60  ;;  %v204_v60 = vld [vmem:[#allocation8 + $0x398] sm:$0xff] }
  0xa4   :  { %1039 = vmatprep.subr.bf16.mxu1 %v3073_v2  ;;  %v3145_v7 = vcombine.high %v204_v60, %v208_v61  ;;  %v3144_v9 = vcombine.low %v204_v60, %v208_v61  ;;  %v3531_v60 = vld [vmem:[#allocation9 + $0x18c] ss:$16 sps:$4 sm:$0xff]   ;;  %v3538_v61 = vld [vmem:[#allocation9 + $0x1c0] ss:$16 sps:$4 sm:$0xff]  }
  0xa5   :  { %999 = vmatpush1.bf16.msra.mxu0 %v3070_v48  ;;  %v192_v48 = vld [vmem:[#allocation8 + $0x338] sm:$0xff] }
  0xa6   :  { %1000 = vmatprep.subr.bf16.mxu0 %v3079_v51  ;;  %v3121_v51 = vcombine.high %v180_v39, %v184_v40  ;;  %v3129_v57 = vcombine.high %v188_v47, %v192_v48  ;;  %v3510_v39 = vld [vmem:[#allocation9 + $0x124] ss:$16 sps:$4 sm:$0xff]   ;;  %v3493_v40 = vld [vmem:[#allocation9 + $0xc8] ss:$16 sps:$4 sm:$0xff]  }
  0xa7   :  { %1040 = vmatpush1.bf16.msra.mxu1 %v3072_v5  ;;  %v216_v5 = vld [vmem:[#allocation8 + $0x3f8] sm:$0xff] }
  0xa8   :  { %1041 = vmatprep.subr.bf16.mxu1 %v3081_v11 }
  0xa9   :  { %1001 = vmatpush1.bf16.msra.mxu0 %v3078_v55  ;;  %v200_v55 = vld [vmem:[#allocation8 + $0x378] sm:$0xff] }
  0xaa   :  { %1002 = vmatprep.subr.bf16.mxu0 %v3087_v59  ;;  %v3128_v59 = vcombine.low %v188_v47, %v192_v48  ;;  %v3137_v0 = vcombine.high %v196_v54, %v200_v55  ;;  %v3136_v2 = vcombine.low %v196_v54, %v200_v55  ;;  %v3522_v47 = vld [vmem:[#allocation9 + $0x164] ss:$16 sps:$4 sm:$0xff]   ;;  %v3505_v48 = vld [vmem:[#allocation9 + $0x108] ss:$16 sps:$4 sm:$0xff]  }
  0xab   :  { %1042 = vmatpush1.bf16.msra.mxu1 %v3080_v13  ;;  %v3466_v13 = vld [vmem:[#allocation9 + $0x40] ss:$16 sps:$4 sm:$0xff]   ;;  %v3534_v54 = vld [vmem:[#allocation9 + $0x1a4] ss:$16 sps:$4 sm:$0xff]   ;;  %v3517_v55 = vld [vmem:[#allocation9 + $0x148] ss:$16 sps:$4 sm:$0xff]  }
  0xac   :  { %1043 = vmatprep.subr.bf16.mxu1 %v3089_v19  ;;  %v3480_v19 = vld [vmem:[#allocation9 + $0x84] ss:$16 sps:$4 sm:$0xff]  }
  0xad   :  { %1003 = vmatpush1.bf16.msra.mxu0 %v3086_v63  ;;  %v3150_v63 = vcombine.low %v211_v50, %v215_v24  ;;  %v3520_v50 = vld [vmem:[#allocation9 + $0x160] ss:$16 sps:$4 sm:$0xff]   ;;  %v3528_v24 = vld [vmem:[#allocation9 + $0x184] ss:$16 sps:$4 sm:$0xff]  }
  0xae   :  { %1004 = vmatprep.subr.bf16.mxu0 %v3095_v4  ;;  %v212_v4 = vld [vmem:[#allocation8 + $0x3d8] sm:$0xff] }
  0xaf   :  { %1044 = vmatpush1.bf16.msra.mxu1 %v3088_v21  ;;  %v3153_v11 = vcombine.high %v212_v4, %v216_v5  ;;  %v3152_v14 = vcombine.low %v212_v4, %v216_v5  ;;  %v3471_v21 = vld [vmem:[#allocation9 + $0x4c] ss:$16 sps:$4 sm:$0xff]   ;;  %v3535_v4 = vld [vmem:[#allocation9 + $0x1a8] ss:$16 sps:$4 sm:$0xff]  }
  0xb0   :  { %1045 = vmatprep.subr.bf16.mxu1 %v3097_v28  ;;  %v3492_v28 = vld [vmem:[#allocation9 + $0xc4] ss:$16 sps:$4 sm:$0xff]   ;;  %v3543_v5 = vld [vmem:[#allocation9 + $0x1cc] ss:$16 sps:$4 sm:$0xff]  }
  0xb1   :  { %1005 = vmatpush1.bf16.msra.mxu0 %v3094_v8  ;;  %v3460_v8 = vld [vmem:[#allocation9 + $0x20] ss:$16 sps:$4 sm:$0xff]  }
  0xb2   :  { %1006 = vmatprep.subr.bf16.mxu0 %v3103_v12  ;;  %v3459_v12 = vld [vmem:[#allocation9 + $0xc] ss:$16 sps:$4 sm:$0xff]  }
  0xb3   :  { %1046 = vmatpush1.bf16.msra.mxu1 %v3096_v30  ;;  %v3483_v30 = vld [vmem:[#allocation9 + $0x8c] ss:$16 sps:$4 sm:$0xff]  }
  0xb4   :  { %1047 = vmatprep.subr.bf16.mxu1 %v3105_v36  ;;  %v3487_v36 = vld [vmem:[#allocation9 + $0xa8] ss:$16 sps:$4 sm:$0xff]  }
  0xb5   :  { %1007 = vmatpush1.bf16.msra.mxu0 %v3102_v16  ;;  %v3457_v16 = vld [vmem:[#allocation9 + $0x8] ss:$16 sps:$4 sm:$0xff]  }
  0xb6   :  { %1008 = vmatprep.subr.bf16.mxu0 %v3111_v20  ;;  %v3463_v20 = vld [vmem:[#allocation9 + $0x28] ss:$16 sps:$4 sm:$0xff]  }
  0xb7   :  { %1048 = vmatpush1.bf16.msra.mxu1 %v3104_v38  ;;  %v3502_v38 = vld [vmem:[#allocation9 + $0x100] ss:$16 sps:$4 sm:$0xff]  }
  0xb8   :  { %1049 = vmatprep.subr.bf16.mxu1 %v3113_v44  ;;  %v3499_v44 = vld [vmem:[#allocation9 + $0xe8] ss:$16 sps:$4 sm:$0xff]  }
  0xb9   :  { %1009 = vmatpush1.bf16.msra.mxu0 %v3110_v25  ;;  %v3469_v25 = vld [vmem:[#allocation9 + $0x48] ss:$16 sps:$4 sm:$0xff]  }
  0xba   :  { %1010 = vmatprep.subr.bf16.mxu0 %v3119_v29  ;;  %v3475_v29 = vld [vmem:[#allocation9 + $0x68] ss:$16 sps:$4 sm:$0xff]  }
  0xbb   :  { %1050 = vmatpush1.bf16.msra.mxu1 %v3112_v46  ;;  %v3514_v46 = vld [vmem:[#allocation9 + $0x140] ss:$16 sps:$4 sm:$0xff]  }
  0xbc   :  { %1051 = vmatprep.subr.bf16.mxu1 %v3121_v51  ;;  %v3511_v51 = vld [vmem:[#allocation9 + $0x128] ss:$16 sps:$4 sm:$0xff]  }
  0xbd   :  { %1011 = vmatpush1.bf16.msra.mxu0 %v3118_v33  ;;  %v3489_v33 = vld [vmem:[#allocation9 + $0xac] ss:$16 sps:$4 sm:$0xff]  }
  0xbe   :  { %1012 = vmatprep.subr.bf16.mxu0 %v3127_v37  ;;  %v3495_v37 = vld [vmem:[#allocation9 + $0xcc] ss:$16 sps:$4 sm:$0xff]  }
  0xbf   :  { %1052 = vmatpush1.bf16.msra.mxu1 %v3120_v53  ;;  %v3526_v53 = vld [vmem:[#allocation9 + $0x180] ss:$16 sps:$4 sm:$0xff]  }
  0xc0   :  { %1053 = vmatprep.subr.bf16.mxu1 %v3129_v57  ;;  %v3532_v57 = vld [vmem:[#allocation9 + $0x1a0] ss:$16 sps:$4 sm:$0xff]  }
  0xc1   :  { %1013 = vmatpush1.bf16.msra.mxu0 %v3126_v41  ;;  %v3501_v41 = vld [vmem:[#allocation9 + $0xec] ss:$16 sps:$4 sm:$0xff]  }
  0xc2   :  { %1014 = vmatprep.subr.bf16.mxu0 %v3135_v45  ;;  %v3507_v45 = vld [vmem:[#allocation9 + $0x10c] ss:$16 sps:$4 sm:$0xff]  }
  0xc3   :  { %1054 = vmatpush1.bf16.msra.mxu1 %v3128_v59  ;;  %v3523_v59 = vld [vmem:[#allocation9 + $0x168] ss:$16 sps:$4 sm:$0xff]  }
  0xc4   :  { %1055 = vmatprep.subr.bf16.mxu1 %v3137_v0  ;;  %v3537_v0 = vld [vmem:[#allocation9 + $0x1ac] ss:$16 sps:$4 sm:$0xff]  }
  0xc5   :  { %1015 = vmatpush1.bf16.msra.mxu0 %v3134_v49  ;;  %v3513_v49 = vld [vmem:[#allocation9 + $0x12c] ss:$16 sps:$4 sm:$0xff]  }
  0xc6   :  { %1016 = vmatprep.subr.bf16.mxu0 %v3143_v52  ;;  %v3519_v52 = vld [vmem:[#allocation9 + $0x14c] ss:$16 sps:$4 sm:$0xff]  }
  0xc7   :  { %1056 = vmatpush1.bf16.msra.mxu1 %v3136_v2  ;;  %v3552_v2 = vld [vmem:[#allocation9 + $0x204] ss:$16 sps:$4 sm:$0xff]  }
  0xc8   :  { %1057 = vmatprep.subr.bf16.mxu1 %v3145_v7  ;;  %v3549_v7 = vld [vmem:[#allocation9 + $0x1ec] ss:$16 sps:$4 sm:$0xff]  }
  0xc9   :  { %1017 = vmatpush1.bf16.msra.mxu0 %v3142_v56  ;;  %v3525_v56 = vld [vmem:[#allocation9 + $0x16c] ss:$16 sps:$4 sm:$0xff]  }
  0xca   :  { %1018 = vmatprep.subr.bf16.mxu0 %v3151_v58  ;;  %v3540_v58 = vld [vmem:[#allocation9 + $0x1c4] ss:$16 sps:$4 sm:$0xff]  }
  0xcb   :  { %1058 = vmatpush1.bf16.msra.mxu1 %v3144_v9  ;;  %v3555_v9 = vld [vmem:[#allocation9 + $0x20c] ss:$16 sps:$4 sm:$0xff]  }
  0xcc   :  { %1059 = vmatprep.subr.bf16.mxu1 %v3153_v11 }
  0xcd   :  { %1019 = vmatpush1.bf16.msra.mxu0 %v3150_v63  ;;  %v3529_v63 = vld [vmem:[#allocation9 + $0x188] ss:$16 sps:$4 sm:$0xff]  }
  0xce   :  { %2644 = vmatprep.subr.bf16.mxu0 %v3456_v62  ;;  %v3546_v62 = vld [vmem:[#allocation9 + $0x1e4] ss:$16 sps:$4 sm:$0xff]  }
  0xcf   :  { %1060 = vmatpush1.bf16.msra.mxu1 %v3152_v14 }
  0xd0   :  { %1021 = vmatmul.mubr.bf16.vlgmr.msra.gmra.mrb[4].mxu0 %v4040_v3  ;;  %2808 = vmatprep.subr.bf16.mxu1 %v3459_v12 }
  0xd1   :  { %2645 = vmatpush1.bf16.msra.mxu0 %v3454_v1  ;;  %v3544_v1 = vld [vmem:[#allocation9 + $0x1e0] ss:$16 sps:$4 sm:$0xff]  }
  0xd2   :  { %2646 = vmatprep.subr.bf16.mxu0 %v3462_v6  ;;  %1062 = vmatmul.mubr.bf16.vlgmr.msra.gmra.mrb[4].mxu1 %v4040_v3  ;;  %v3490_v3 = vld [vmem:[#allocation9 + $0xc0] ss:$16 sps:$4 sm:$0xff]   ;;  %v3541_v6 = vld [vmem:[#allocation9 + $0x1c8] ss:$16 sps:$4 sm:$0xff]  }
  0xd3   :  { %2809 = vmatpush1.bf16.msra.mxu1 %v3457_v16 }
  0xd4   :  { %2810 = vmatprep.subr.bf16.mxu1 %v3465_v17 }
  0xd5   :  { %2647 = vmatpush1.bf16.msra.mxu0 %v3460_v8  ;;  %v3547_v8 = vld [vmem:[#allocation9 + $0x1e8] ss:$16 sps:$4 sm:$0xff]  }
  0xd6   :  { %2648 = vmatprep.subr.bf16.mxu0 %v3468_v10  ;;  %v219_v10 = vlaneseq }
  0xd7   :  { %2811 = vmatpush1.bf16.msra.mxu1 %v3463_v20 }
  0xd8   :  { %2812 = vmatprep.subr.bf16.mxu1 %v3471_v21  ;;  %v4048_v11 = vshrl.u32 %v219_v10, 7  ;;  %v3612_v10 = vld [vmem:[#allocation9 + $0x344] ss:$16 sps:$4 sm:$0xff]  }
  0xd9   :  { %2649 = vmatpush1.bf16.msra.mxu0 %v3466_v13  ;;  %v4056_v13 = vld [vmem:[%s4115_s3] sm:$0xff] }
  0xda   :  { %2650 = vmatprep.subr.bf16.mxu0 %v3474_v15  ;;  %v4051_v12 = vsub.s32 0, %v4048_v11  ;;  %v4059_v14 = vsub.s32 1, %v4048_v11 }
  0xdb   :  { %2813 = vmatpush1.bf16.msra.mxu1 %v3469_v25 }
  0xdc   :  { %2814 = vmatprep.subr.bf16.mxu1 %v3477_v26  ;;  %v222_v15 = vrot.slane %v4056_v13, %v4051_v12  ;;  %v226_v16 = vrot.slane %v4056_v13, %v4059_v14  ;;  %v4066_v26 = vsub.s32 3, %v4048_v11 }
  0xdd   :  { %2651 = vmatpush1.bf16.msra.mxu0 %v3472_v18 }
  0xde   :  { %2652 = vmatprep.subr.bf16.mxu0 %v3480_v19 }
  0xdf   :  { %2815 = vmatpush1.bf16.msra.mxu1 %v3475_v29  ;;  %v3553_v29 = vld [vmem:[#allocation9 + $0x208] ss:$16 sps:$4 sm:$0xff]  }
  0xe0   :  { %2816 = vmatprep.subr.bf16.mxu1 %v3483_v30 }
  0xe1   :  { %2653 = vmatpush1.bf16.msra.mxu0 %v3478_v22 }
  0xe2   :  { %2654 = vmatprep.subr.bf16.mxu0 %v3486_v23 }
  0xe3   :  { %2817 = vmatpush1.bf16.msra.mxu1 %v3481_v32  ;;  %v234_v32 = vrot.slane %v4056_v13, %v4066_v26 }
  0xe4   :  { %2818 = vmatprep.subr.bf16.mxu1 %v3489_v33  ;;  %v3556_v33 = vld [vmem:[#allocation9 + $0x220] ss:$16 sps:$4 sm:$0xff]  }
  0xe5   :  { %2655 = vmatpush1.bf16.msra.mxu0 %v3484_v27 }
  0xe6   :  { %2656 = vmatprep.subr.bf16.mxu0 %v3492_v28  ;;  %v3550_v28 = vld [vmem:[#allocation9 + $0x200] ss:$16 sps:$4 sm:$0xff]  }
  0xe7   :  { %2819 = vmatpush1.bf16.msra.mxu1 %v3487_v36  ;;  %v3567_v36 = vld [vmem:[#allocation9 + $0x24c] ss:$16 sps:$4 sm:$0xff]  }
  0xe8   :  { %2820 = vmatprep.subr.bf16.mxu1 %v3495_v37 }
  0xe9   :  { %2657 = vmatpush1.bf16.msra.mxu0 %v3490_v3  ;;  %v3558_v3 = vld [vmem:[#allocation9 + $0x224] ss:$16 sps:$4 sm:$0xff]  }
  0xea   :  { %2658 = vmatprep.subr.bf16.mxu0 %v3498_v31  ;;  %v3561_v31 = vld [vmem:[#allocation9 + $0x22c] ss:$16 sps:$4 sm:$0xff]  }
  0xeb   :  { %2821 = vmatpush1.bf16.msra.mxu1 %v3493_v40 }
  0xec   :  { %2822 = vmatprep.subr.bf16.mxu1 %v3501_v41  ;;  %v3562_v41 = vld [vmem:[#allocation9 + $0x240] ss:$16 sps:$4 sm:$0xff]  }
  0xed   :  { %2659 = vmatpush1.bf16.msra.mxu0 %v3496_v34  ;;  %v3559_v34 = vld [vmem:[#allocation9 + $0x228] ss:$16 sps:$4 sm:$0xff]  }
  0xee   :  { %2660 = vmatprep.subr.bf16.mxu0 %v3504_v35  ;;  %v3564_v35 = vld [vmem:[#allocation9 + $0x244] ss:$16 sps:$4 sm:$0xff]  }
  0xef   :  { %2823 = vmatpush1.bf16.msra.mxu1 %v3499_v44  ;;  %v3570_v44 = vld [vmem:[#allocation9 + $0x264] ss:$16 sps:$4 sm:$0xff]  }
  0xf0   :  { %2824 = vmatprep.subr.bf16.mxu1 %v3507_v45  ;;  %v3573_v45 = vld [vmem:[#allocation9 + $0x26c] ss:$16 sps:$4 sm:$0xff]  }
  0xf1   :  { %2661 = vmatpush1.bf16.msra.mxu0 %v3502_v38 }
  0xf2   :  { %2662 = vmatprep.subr.bf16.mxu0 %v3510_v39 }
  0xf3   :  { %2825 = vmatpush1.bf16.msra.mxu1 %v3505_v48  ;;  %v3568_v48 = vld [vmem:[#allocation9 + $0x260] ss:$16 sps:$4 sm:$0xff]  }
  0xf4   :  { %2826 = vmatprep.subr.bf16.mxu1 %v3513_v49  ;;  %v3571_v49 = vld [vmem:[#allocation9 + $0x268] ss:$16 sps:$4 sm:$0xff]  }
  0xf5   :  { %2663 = vmatpush1.bf16.msra.mxu0 %v3508_v42  ;;  %v3565_v42 = vld [vmem:[#allocation9 + $0x248] ss:$16 sps:$4 sm:$0xff]  }
  0xf6   :  { %2664 = vmatprep.subr.bf16.mxu0 %v3516_v43 }
  0xf7   :  { %2827 = vmatpush1.bf16.msra.mxu1 %v3511_v51  ;;  %v3574_v51 = vld [vmem:[#allocation9 + $0x280] ss:$16 sps:$4 sm:$0xff]  }
  0xf8   :  { %2828 = vmatprep.subr.bf16.mxu1 %v3519_v52  ;;  %v3577_v52 = vld [vmem:[#allocation9 + $0x288] ss:$16 sps:$4 sm:$0xff]  }
  0xf9   :  { %2665 = vmatpush1.bf16.msra.mxu0 %v3514_v46 }
  0xfa   :  { %2666 = vmatprep.subr.bf16.mxu0 %v3522_v47 }
  0xfb   :  { %2829 = vmatpush1.bf16.msra.mxu1 %v3517_v55  ;;  %v3580_v55 = vld [vmem:[#allocation9 + $0x2a0] ss:$16 sps:$4 sm:$0xff]  }
  0xfc   :  { %2830 = vmatprep.subr.bf16.mxu1 %v3525_v56  ;;  %v3583_v56 = vld [vmem:[#allocation9 + $0x2a8] ss:$16 sps:$4 sm:$0xff]  }
  0xfd   :  { %2667 = vmatpush1.bf16.msra.mxu0 %v3520_v50  ;;  %v3576_v50 = vld [vmem:[#allocation9 + $0x284] ss:$16 sps:$4 sm:$0xff]  }
  0xfe   :  { %2668 = vmatprep.subr.bf16.mxu0 %v3528_v24  ;;  %v3579_v24 = vld [vmem:[#allocation9 + $0x28c] ss:$16 sps:$4 sm:$0xff]  }
  0xff   :  { %2831 = vmatpush1.bf16.msra.mxu1 %v3523_v59  ;;  %v3586_v59 = vld [vmem:[#allocation9 + $0x2c0] ss:$16 sps:$4 sm:$0xff]  }
 0x100   :  { %2832 = vmatprep.subr.bf16.mxu1 %v3531_v60  ;;  %v3589_v60 = vld [vmem:[#allocation9 + $0x2c8] ss:$16 sps:$4 sm:$0xff]  }
 0x101   :  { %2669 = vmatpush1.bf16.msra.mxu0 %v3526_v53  ;;  %v3582_v53 = vld [vmem:[#allocation9 + $0x2a4] ss:$16 sps:$4 sm:$0xff]  }
 0x102   :  { %2670 = vmatprep.subr.bf16.mxu0 %v3534_v54  ;;  %v3585_v54 = vld [vmem:[#allocation9 + $0x2ac] ss:$16 sps:$4 sm:$0xff]  }
 0x103   :  { %2833 = vmatpush1.bf16.msra.mxu1 %v3529_v63  ;;  %v3592_v63 = vld [vmem:[#allocation9 + $0x2e0] ss:$16 sps:$4 sm:$0xff]  }
 0x104   :  { %2834 = vmatprep.subr.bf16.mxu1 %v3537_v0  ;;  %v3595_v0 = vld [vmem:[#allocation9 + $0x2e8] ss:$16 sps:$4 sm:$0xff]  }
 0x105   :  { %2671 = vmatpush1.bf16.msra.mxu0 %v3532_v57  ;;  %v3588_v57 = vld [vmem:[#allocation9 + $0x2c4] ss:$16 sps:$4 sm:$0xff]  }
 0x106   :  { %2672 = vmatprep.subr.bf16.mxu0 %v3540_v58  ;;  %v3591_v58 = vld [vmem:[#allocation9 + $0x2cc] ss:$16 sps:$4 sm:$0xff]  }
 0x107   :  { %2835 = vmatpush1.bf16.msra.mxu1 %v3535_v4  ;;  %v3598_v4 = vld [vmem:[#allocation9 + $0x300] ss:$16 sps:$4 sm:$0xff]  }
 0x108   :  { %2836 = vmatprep.subr.bf16.mxu1 %v3543_v5  ;;  %v3601_v5 = vld [vmem:[#allocation9 + $0x308] ss:$16 sps:$4 sm:$0xff]  }
 0x109   :  { %2673 = vmatpush1.bf16.msra.mxu0 %v3538_v61  ;;  %v3594_v61 = vld [vmem:[#allocation9 + $0x2e4] ss:$16 sps:$4 sm:$0xff]  }
 0x10a   :  { %2674 = vmatprep.subr.bf16.mxu0 %v3546_v62  ;;  %v3597_v62 = vld [vmem:[#allocation9 + $0x2ec] ss:$16 sps:$4 sm:$0xff]  }
 0x10b   :  { %2837 = vmatpush1.bf16.msra.mxu1 %v3541_v6  ;;  %v3606_v6 = vld [vmem:[#allocation9 + $0x324] ss:$16 sps:$4 sm:$0xff]  }
 0x10c   :  { %2838 = vmatprep.subr.bf16.mxu1 %v3549_v7  ;;  %v3609_v7 = vld [vmem:[#allocation9 + $0x32c] ss:$16 sps:$4 sm:$0xff]  }
 0x10d   :  { %2675 = vmatpush1.bf16.msra.mxu0 %v3544_v1  ;;  %v3600_v1 = vld [vmem:[#allocation9 + $0x304] ss:$16 sps:$4 sm:$0xff]  }
 0x10e   :  { %2685 = vmatprep.subr.bf16.mxu0 %v3552_v2  ;;  %v3603_v2 = vld [vmem:[#allocation9 + $0x30c] ss:$16 sps:$4 sm:$0xff]  }
 0x10f   :  { %2839 = vmatpush1.bf16.msra.mxu1 %v3547_v8  ;;  %v3604_v8 = vld [vmem:[#allocation9 + $0x320] ss:$16 sps:$4 sm:$0xff]  }
 0x110   :  { %2849 = vmatprep.subr.bf16.mxu1 %v3555_v9  ;;  %v3607_v9 = vld [vmem:[#allocation9 + $0x328] ss:$16 sps:$4 sm:$0xff]  }
 0x163   :  { %v940_v17 = vpop.f32.mrb[0].mxu0 }
 0x164   :  { %v941_v18 = vadd.f32 %v940_v17, %v222_v15  ;;  %v942_v19 = vpop.f32.mrb[1].mxu0  ;;  %v3615_v15 = vld [vmem:[#allocation9 + $0x34c] ss:$16 sps:$4 sm:$0xff]   ;;  %v3613_v17 = vld [vmem:[#allocation9 + $0x348] ss:$16 sps:$4 sm:$0xff]  }
 0x165   :  { %v943_v20 = vadd.f32 %v942_v19, %v226_v16  ;;  %v944_v21 = vpop.f32.mrb[2].mxu0  ;;  %v4070_v37 = vpop.f32.mrb[0].mxu1  ;;  %v3610_v16 = vld [vmem:[#allocation9 + $0x340] ss:$16 sps:$4 sm:$0xff]   ;;  %v3621_v19 = vld [vmem:[#allocation9 + $0x36c] ss:$16 sps:$4 sm:$0xff]  }
 0x166   :  { %v1070_v22 = vmax.f32 %v941_v18, 0.0  ;;  %v945_v23 = vpop.f32.mrb[3].mxu0  ;;  %v983_v38 = vpop.f32.mrb[1].mxu1  ;;  %v3618_v18 = vld [vmem:[#allocation9 + $0x364] ss:$16 sps:$4 sm:$0xff]  }
 0x167   :  { %v1071_v25 = vmax.f32 %v943_v20, 0.0  ;;  %v984_v39 = vadd.f32 %v983_v38, %v234_v32  ;;  %v985_v40 = vpop.f32.mrb[2].mxu1  ;;  %v3616_v20 = vld [vmem:[#allocation9 + $0x360] ss:$16 sps:$4 sm:$0xff]   ;;  %v3619_v21 = vld [vmem:[#allocation9 + $0x368] ss:$16 sps:$4 sm:$0xff]  }
 0x168   :  { %v1078_v30 = vpack.c.bf16 %v1070_v22, %v1070_v22  ;;  %v986_v43 = vpop.f32.mrb[3].mxu1  ;;  %v3624_v22 = vld [vmem:[#allocation9 + $0x384] ss:$16 sps:$4 sm:$0xff]   ;;  %v3627_v23 = vld [vmem:[#allocation9 + $0x38c] ss:$16 sps:$4 sm:$0xff]  }
 0x169   :  { %v1079_v27 = vpack.c.bf16 %v1071_v25, %v1071_v25  ;;  %v1073_v46 = vmax.f32 %v984_v39, 0.0  ;;  %v4073_v25 = vsub.s32 2, %v4048_v11  ;;  %v3631_v32 = vld [vmem:[#allocation9 + $0x3a8] ss:$16 sps:$4 sm:$0xff]   ;;  %v3634_v38 = vld [vmem:[#allocation9 + $0x3c0] ss:$16 sps:$4 sm:$0xff]  }
 0x16a   :  { %v3637_v39 = vld [vmem:[#allocation9 + $0x3c8] ss:$16 sps:$4 sm:$0xff]  }
 0x16b   :  { %2676 = vmatprep.mubr.bf16.mxu0 %v1079_v27  ;;  %2840 = vmatprep.mubr.bf16.mxu1 %v1079_v27  ;;  %v1081_v47 = vpack.c.bf16 %v1073_v46, %v1073_v46  ;;  %v3622_v27 = vld [vmem:[#allocation9 + $0x380] ss:$16 sps:$4 sm:$0xff]  }
 0x16c   :  { %2677 = vmatmul.mubr.bf16.vlgmr.msra.gmra.mrb[8].mxu0 %v1078_v30  ;;  %2841 = vmatmul.mubr.bf16.vlgmr.msra.gmra.mrb[8].mxu1 %v1078_v30  ;;  %v3633_v30 = vld [vmem:[#allocation9 + $0x3ac] ss:$16 sps:$4 sm:$0xff]   ;;  %v3640_v46 = vld [vmem:[#allocation9 + $0x3e0] ss:$16 sps:$4 sm:$0xff]  }
 0x16d   :  { %2686 = vmatpush1.bf16.msra.mxu0 %v3550_v28  ;;  %2850 = vmatpush1.bf16.msra.mxu1 %v3553_v29  ;;  %v3625_v28 = vld [vmem:[#allocation9 + $0x388] ss:$16 sps:$4 sm:$0xff]   ;;  %v3630_v29 = vld [vmem:[#allocation9 + $0x3a4] ss:$16 sps:$4 sm:$0xff]  }
 0x16e   :  { %2687 = vmatprep.subr.bf16.mxu0 %v3558_v3  ;;  %2851 = vmatprep.subr.bf16.mxu1 %v3561_v31  ;;  %v230_v3 = vrot.slane %v4056_v13, %v4073_v25  ;;  %v3628_v31 = vld [vmem:[#allocation9 + $0x3a0] ss:$16 sps:$4 sm:$0xff]  }
 0x16f   :  { %2717 = vmatprep.mubr.bf16.mxu0 %v1081_v47  ;;  %2881 = vmatprep.mubr.bf16.mxu1 %v1081_v47  ;;  %v3643_v47 = vld [vmem:[#allocation9 + $0x3e8] ss:$16 sps:$4 sm:$0xff]  }
 0x171   :  { %2688 = vmatpush1.bf16.msra.mxu0 %v3556_v33  ;;  %2852 = vmatpush1.bf16.msra.mxu1 %v3559_v34  ;;  %v241_v33 = vsub.s32 5, %v4048_v11  ;;  %v3636_v34 = vld [vmem:[#allocation9 + $0x3c4] ss:$16 sps:$4 sm:$0xff]  }
 0x172   :  { %2689 = vmatprep.subr.bf16.mxu0 %v3564_v35  ;;  %2853 = vmatprep.subr.bf16.mxu1 %v3567_v36  ;;  %v3639_v35 = vld [vmem:[#allocation9 + $0x3cc] ss:$16 sps:$4 sm:$0xff]   ;;  %v982_v36 = vadd.f32 %v4070_v37, %v230_v3  ;;  %v3691_v3 = vld [vmem:[#allocation9 + $0x4e8] ss:$16 sps:$4 sm:$0xff]  }
 0x173   :  { %v242_v40 = vrot.slane %v4056_v13, %v241_v33  ;;  %v3694_v33 = vld [vmem:[#allocation9 + $0x500] ss:$16 sps:$4 sm:$0xff]  }
 0x175   :  { %2690 = vmatpush1.bf16.msra.mxu0 %v3562_v41  ;;  %2854 = vmatpush1.bf16.msra.mxu1 %v3565_v42  ;;  %v3642_v41 = vld [vmem:[#allocation9 + $0x3e4] ss:$16 sps:$4 sm:$0xff]   ;;  %v3645_v42 = vld [vmem:[#allocation9 + $0x3ec] ss:$16 sps:$4 sm:$0xff]  }
 0x176   :  { %2691 = vmatprep.subr.bf16.mxu0 %v3570_v44  ;;  %2855 = vmatprep.subr.bf16.mxu1 %v3573_v45  ;;  %v1072_v44 = vmax.f32 %v982_v36, 0.0  ;;  %v3705_v36 = vld [vmem:[#allocation9 + $0x52c] ss:$16 sps:$4 sm:$0xff]  }
 0x179   :  { %2692 = vmatpush1.bf16.msra.mxu0 %v3568_v48  ;;  %2856 = vmatpush1.bf16.msra.mxu1 %v3571_v49  ;;  %v3648_v49 = vld [vmem:[#allocation9 + $0x404] ss:$16 sps:$4 sm:$0xff]  }
 0x17a   :  { %2693 = vmatprep.subr.bf16.mxu0 %v3576_v50  ;;  %2857 = vmatprep.subr.bf16.mxu1 %v3579_v24  ;;  %v3651_v50 = vld [vmem:[#allocation9 + $0x40c] ss:$16 sps:$4 sm:$0xff]  }
 0x17d   :  { %2694 = vmatpush1.bf16.msra.mxu0 %v3574_v51  ;;  %2858 = vmatpush1.bf16.msra.mxu1 %v3577_v52  ;;  %v1080_v52 = vpack.c.bf16 %v1072_v44, %v1072_v44  ;;  %v3709_v44 = vld [vmem:[#allocation9 + $0x548] ss:$16 sps:$4 sm:$0xff]  }
 0x17e   :  { %2695 = vmatprep.subr.bf16.mxu0 %v3582_v53  ;;  %2859 = vmatprep.subr.bf16.mxu1 %v3585_v54  ;;  %v3646_v53 = vld [vmem:[#allocation9 + $0x400] ss:$16 sps:$4 sm:$0xff]   ;;  %v3649_v54 = vld [vmem:[#allocation9 + $0x408] ss:$16 sps:$4 sm:$0xff]  }
 0x181   :  { %2696 = vmatpush1.bf16.msra.mxu0 %v3580_v55  ;;  %2860 = vmatpush1.bf16.msra.mxu1 %v3583_v56  ;;  %v3654_v55 = vld [vmem:[#allocation9 + $0x424] ss:$16 sps:$4 sm:$0xff]   ;;  %v3657_v56 = vld [vmem:[#allocation9 + $0x42c] ss:$16 sps:$4 sm:$0xff]  }
 0x182   :  { %2697 = vmatprep.subr.bf16.mxu0 %v3588_v57  ;;  %2861 = vmatprep.subr.bf16.mxu1 %v3591_v58  ;;  %v3652_v58 = vld [vmem:[#allocation9 + $0x420] ss:$16 sps:$4 sm:$0xff]  }
 0x185   :  { %2698 = vmatpush1.bf16.msra.mxu0 %v3586_v59  ;;  %2862 = vmatpush1.bf16.msra.mxu1 %v3589_v60  ;;  %v3655_v59 = vld [vmem:[#allocation9 + $0x428] ss:$16 sps:$4 sm:$0xff]   ;;  %v3660_v60 = vld [vmem:[#allocation9 + $0x444] ss:$16 sps:$4 sm:$0xff]  }
 0x186   :  { %2699 = vmatprep.subr.bf16.mxu0 %v3594_v61  ;;  %2863 = vmatprep.subr.bf16.mxu1 %v3597_v62  ;;  %v3663_v61 = vld [vmem:[#allocation9 + $0x44c] ss:$16 sps:$4 sm:$0xff]  }
 0x189   :  { %2700 = vmatpush1.bf16.msra.mxu0 %v3592_v63  ;;  %2864 = vmatpush1.bf16.msra.mxu1 %v3595_v0 }
 0x18a   :  { %2701 = vmatprep.subr.bf16.mxu0 %v3600_v1  ;;  %2865 = vmatprep.subr.bf16.mxu1 %v3603_v2  ;;  %v3658_v1 = vld [vmem:[#allocation9 + $0x440] ss:$16 sps:$4 sm:$0xff]   ;;  %v3661_v2 = vld [vmem:[#allocation9 + $0x448] ss:$16 sps:$4 sm:$0xff]  }
 0x18d   :  { %2702 = vmatpush1.bf16.msra.mxu0 %v3598_v4  ;;  %2866 = vmatpush1.bf16.msra.mxu1 %v3601_v5  ;;  %v3666_v5 = vld [vmem:[#allocation9 + $0x464] ss:$16 sps:$4 sm:$0xff]  }
 0x18e   :  { %2703 = vmatprep.subr.bf16.mxu0 %v3606_v6  ;;  %2867 = vmatprep.subr.bf16.mxu1 %v3609_v7  ;;  %v3669_v6 = vld [vmem:[#allocation9 + $0x46c] ss:$16 sps:$4 sm:$0xff]   ;;  %v3664_v7 = vld [vmem:[#allocation9 + $0x460] ss:$16 sps:$4 sm:$0xff]  }
 0x191   :  { %2704 = vmatpush1.bf16.msra.mxu0 %v3604_v8  ;;  %2868 = vmatpush1.bf16.msra.mxu1 %v3607_v9  ;;  %v3667_v8 = vld [vmem:[#allocation9 + $0x468] ss:$16 sps:$4 sm:$0xff]   ;;  %v3672_v9 = vld [vmem:[#allocation9 + $0x484] ss:$16 sps:$4 sm:$0xff]  }
 0x192   :  { %2705 = vmatprep.subr.bf16.mxu0 %v3612_v10  ;;  %2869 = vmatprep.subr.bf16.mxu1 %v3615_v15  ;;  %v3675_v10 = vld [vmem:[#allocation9 + $0x48c] ss:$16 sps:$4 sm:$0xff]   ;;  %v3670_v15 = vld [vmem:[#allocation9 + $0x480] ss:$16 sps:$4 sm:$0xff]  }
 0x195   :  { %2706 = vmatpush1.bf16.msra.mxu0 %v3610_v16  ;;  %2870 = vmatpush1.bf16.msra.mxu1 %v3613_v17  ;;  %v3673_v16 = vld [vmem:[#allocation9 + $0x488] ss:$16 sps:$4 sm:$0xff]   ;;  %v3678_v17 = vld [vmem:[#allocation9 + $0x4a4] ss:$16 sps:$4 sm:$0xff]  }
 0x196   :  { %2707 = vmatprep.subr.bf16.mxu0 %v3618_v18  ;;  %2871 = vmatprep.subr.bf16.mxu1 %v3621_v19  ;;  %v3681_v18 = vld [vmem:[#allocation9 + $0x4ac] ss:$16 sps:$4 sm:$0xff]   ;;  %v3676_v19 = vld [vmem:[#allocation9 + $0x4a0] ss:$16 sps:$4 sm:$0xff]  }
 0x199   :  { %2708 = vmatpush1.bf16.msra.mxu0 %v3616_v20  ;;  %2872 = vmatpush1.bf16.msra.mxu1 %v3619_v21  ;;  %v3679_v20 = vld [vmem:[#allocation9 + $0x4a8] ss:$16 sps:$4 sm:$0xff]   ;;  %v3684_v21 = vld [vmem:[#allocation9 + $0x4c4] ss:$16 sps:$4 sm:$0xff]  }
 0x19a   :  { %2709 = vmatprep.subr.bf16.mxu0 %v3624_v22  ;;  %2873 = vmatprep.subr.bf16.mxu1 %v3627_v23  ;;  %v3687_v22 = vld [vmem:[#allocation9 + $0x4cc] ss:$16 sps:$4 sm:$0xff]   ;;  %v3682_v23 = vld [vmem:[#allocation9 + $0x4c0] ss:$16 sps:$4 sm:$0xff]  }
 0x19d   :  { %2710 = vmatpush1.bf16.msra.mxu0 %v3622_v27  ;;  %2874 = vmatpush1.bf16.msra.mxu1 %v3625_v28  ;;  %v3685_v27 = vld [vmem:[#allocation9 + $0x4c8] ss:$16 sps:$4 sm:$0xff]   ;;  %v3690_v28 = vld [vmem:[#allocation9 + $0x4e4] ss:$16 sps:$4 sm:$0xff]  }
 0x19e   :  { %2711 = vmatprep.subr.bf16.mxu0 %v3630_v29  ;;  %2875 = vmatprep.subr.bf16.mxu1 %v3633_v30  ;;  %v3693_v29 = vld [vmem:[#allocation9 + $0x4ec] ss:$16 sps:$4 sm:$0xff]   ;;  %v3688_v30 = vld [vmem:[#allocation9 + $0x4e0] ss:$16 sps:$4 sm:$0xff]  }
 0x1a1   :  { %2712 = vmatpush1.bf16.msra.mxu0 %v3628_v31  ;;  %2876 = vmatpush1.bf16.msra.mxu1 %v3631_v32  ;;  %v3696_v31 = vld [vmem:[#allocation9 + $0x504] ss:$16 sps:$4 sm:$0xff]   ;;  %v3699_v32 = vld [vmem:[#allocation9 + $0x50c] ss:$16 sps:$4 sm:$0xff]  }
 0x1a2   :  { %2713 = vmatprep.subr.bf16.mxu0 %v3636_v34  ;;  %2877 = vmatprep.subr.bf16.mxu1 %v3639_v35  ;;  %v3697_v34 = vld [vmem:[#allocation9 + $0x508] ss:$16 sps:$4 sm:$0xff]   ;;  %v3702_v35 = vld [vmem:[#allocation9 + $0x524] ss:$16 sps:$4 sm:$0xff]  }
 0x1a3   :  { %v4080_v43 = vpop.f32.mrb[4].mxu0 }
 0x1a4   :  { %v1024_v45 = vpop.f32.mrb[5].mxu0 }
 0x1a5   :  { %2714 = vmatpush1.bf16.msra.mxu0 %v3634_v38  ;;  %2878 = vmatpush1.bf16.msra.mxu1 %v3637_v39  ;;  %v1025_v48 = vadd.f32 %v1024_v45, %v242_v40  ;;  %v1026_v37 = vpop.f32.mrb[6].mxu0  ;;  %v4082_v62 = vpop.f32.mrb[4].mxu1  ;;  %v3700_v38 = vld [vmem:[#allocation9 + $0x520] ss:$16 sps:$4 sm:$0xff]   ;;  %v3703_v39 = vld [vmem:[#allocation9 + $0x528] ss:$16 sps:$4 sm:$0xff]  }
 0x1a6   :  { %2715 = vmatprep.subr.bf16.mxu0 %v3642_v41  ;;  %2879 = vmatprep.subr.bf16.mxu1 %v3645_v42  ;;  %v1027_v24 = vpop.f32.mrb[7].mxu0  ;;  %v4084_v63 = vpop.f32.mrb[5].mxu1  ;;  %v3708_v40 = vld [vmem:[#allocation9 + $0x544] ss:$16 sps:$4 sm:$0xff]   ;;  %v3711_v41 = vld [vmem:[#allocation9 + $0x54c] ss:$16 sps:$4 sm:$0xff]  }
 0x1a7   :  { %v1075_v51 = vmax.f32 %v1025_v48, 0.0  ;;  %v1067_v0 = vpop.f32.mrb[6].mxu1  ;;  %v3706_v42 = vld [vmem:[#allocation9 + $0x540] ss:$16 sps:$4 sm:$0xff]   ;;  %v3714_v45 = vld [vmem:[#allocation9 + $0x564] ss:$16 sps:$4 sm:$0xff]  }
 0x1a8   :  { %v1068_v4 = vpop.f32.mrb[7].mxu1  ;;  %v3715_v48 = vld [vmem:[#allocation9 + $0x568] ss:$16 sps:$4 sm:$0xff]   ;;  %v3720_v37 = vld [vmem:[#allocation9 + $0x584] ss:$16 sps:$4 sm:$0xff]  }
 0x1a9   :  { %2716 = vmatpush1.bf16.msra.mxu0 %v3640_v46  ;;  %2880 = vmatpush1.bf16.msra.mxu1 %v3643_v47  ;;  %v1083_v57 = vpack.c.bf16 %v1075_v51, %v1075_v51  ;;  %v3717_v46 = vld [vmem:[#allocation9 + $0x56c] ss:$16 sps:$4 sm:$0xff]   ;;  %v3712_v47 = vld [vmem:[#allocation9 + $0x560] ss:$16 sps:$4 sm:$0xff]   ;;  %v3721_v51 = vld [vmem:[#allocation9 + $0x588] ss:$16 sps:$4 sm:$0xff]  }
 0x1aa   :  { %2726 = vmatprep.subr.bf16.mxu0 %v3648_v49  ;;  %2890 = vmatprep.subr.bf16.mxu1 %v3651_v50  ;;  %v3723_v49 = vld [vmem:[#allocation9 + $0x58c] ss:$16 sps:$4 sm:$0xff]   ;;  %v237_v50 = vsub.s32 4, %v4048_v11  ;;  %v3718_v24 = vld [vmem:[#allocation9 + $0x580] ss:$16 sps:$4 sm:$0xff]  }
 0x1ab   :  { %v3730_v0 = vld [vmem:[#allocation9 + $0x5c0] ss:$16 sps:$4 sm:$0xff]   ;;  %v3741_v4 = vld [vmem:[#allocation9 + $0x5ec] ss:$16 sps:$4 sm:$0xff]  }
 0x1ac   :  { %2718 = vmatmul.mubr.bf16.vlgmr.msra.gmra.mrb[8].mxu0 %v1080_v52  ;;  %2882 = vmatmul.mubr.bf16.vlgmr.msra.gmra.mrb[8].mxu1 %v1080_v52  ;;  %v3726_v52 = vld [vmem:[#allocation9 + $0x5a4] ss:$16 sps:$4 sm:$0xff]  }
 0x1ad   :  { %2727 = vmatpush1.bf16.msra.mxu0 %v3646_v53  ;;  %2891 = vmatpush1.bf16.msra.mxu1 %v3649_v54  ;;  %v3729_v53 = vld [vmem:[#allocation9 + $0x5ac] ss:$16 sps:$4 sm:$0xff]   ;;  %v249_v54 = vsub.s32 7, %v4048_v11 }
 0x1ae   :  { %2728 = vmatprep.subr.bf16.mxu0 %v3654_v55  ;;  %2892 = vmatprep.subr.bf16.mxu1 %v3657_v56  ;;  %v238_v55 = vrot.slane %v4056_v13, %v237_v50  ;;  %v3724_v56 = vld [vmem:[#allocation9 + $0x5a0] ss:$16 sps:$4 sm:$0xff]   ;;  %v3795_v50 = vld [vmem:[#allocation9 + $0x70c] ss:$16 sps:$4 sm:$0xff]  }
 0x1af   :  { %2758 = vmatprep.mubr.bf16.mxu0 %v1083_v57  ;;  %2922 = vmatprep.mubr.bf16.mxu1 %v1083_v57  ;;  %v3727_v57 = vld [vmem:[#allocation9 + $0x5a8] ss:$16 sps:$4 sm:$0xff]  }
 0x1b1   :  { %2729 = vmatpush1.bf16.msra.mxu0 %v3652_v58  ;;  %2893 = vmatpush1.bf16.msra.mxu1 %v3655_v59  ;;  %v3732_v58 = vld [vmem:[#allocation9 + $0x5c4] ss:$16 sps:$4 sm:$0xff]   ;;  %v3735_v59 = vld [vmem:[#allocation9 + $0x5cc] ss:$16 sps:$4 sm:$0xff]  }
 0x1b2   :  { %2730 = vmatprep.subr.bf16.mxu0 %v3660_v60  ;;  %2894 = vmatprep.subr.bf16.mxu1 %v3663_v61  ;;  %v250_v60 = vrot.slane %v4056_v13, %v249_v54  ;;  %v1023_v61 = vadd.f32 %v4080_v43, %v238_v55  ;;  %v3796_v54 = vld [vmem:[#allocation9 + $0x720] ss:$16 sps:$4 sm:$0xff]   ;;  %v3799_v55 = vld [vmem:[#allocation9 + $0x728] ss:$16 sps:$4 sm:$0xff]  }
 0x1b5   :  { %2731 = vmatpush1.bf16.msra.mxu0 %v3658_v1  ;;  %2895 = vmatpush1.bf16.msra.mxu1 %v3661_v2  ;;  %v3733_v1 = vld [vmem:[#allocation9 + $0x5c8] ss:$16 sps:$4 sm:$0xff]   ;;  %v3738_v2 = vld [vmem:[#allocation9 + $0x5e4] ss:$16 sps:$4 sm:$0xff]  }
 0x1b6   :  { %2732 = vmatprep.subr.bf16.mxu0 %v3666_v5  ;;  %2896 = vmatprep.subr.bf16.mxu1 %v3669_v6  ;;  %v1066_v5 = vadd.f32 %v4084_v63, %v250_v60  ;;  %v1074_v6 = vmax.f32 %v1023_v61, 0.0  ;;  %v3810_v60 = vld [vmem:[#allocation9 + $0x764] ss:$16 sps:$4 sm:$0xff]   ;;  %v3813_v61 = vld [vmem:[#allocation9 + $0x76c] ss:$16 sps:$4 sm:$0xff]  }
 0x1b8   :  { %v1077_v43 = vmax.f32 %v1066_v5, 0.0  ;;  %v3814_v5 = vld [vmem:[#allocation9 + $0x780] ss:$16 sps:$4 sm:$0xff]  }
 0x1b9   :  { %2733 = vmatpush1.bf16.msra.mxu0 %v3664_v7  ;;  %2897 = vmatpush1.bf16.msra.mxu1 %v3667_v8  ;;  %v3736_v7 = vld [vmem:[#allocation9 + $0x5e0] ss:$16 sps:$4 sm:$0xff]   ;;  %v3739_v8 = vld [vmem:[#allocation9 + $0x5e8] ss:$16 sps:$4 sm:$0xff]  }
 0x1ba   :  { %2734 = vmatprep.subr.bf16.mxu0 %v3672_v9  ;;  %2898 = vmatprep.subr.bf16.mxu1 %v3675_v10  ;;  %v3744_v9 = vld [vmem:[#allocation9 + $0x604] ss:$16 sps:$4 sm:$0xff]   ;;  %v3747_v10 = vld [vmem:[#allocation9 + $0x60c] ss:$16 sps:$4 sm:$0xff]   ;;  %v1085_v63 = vpack.c.bf16 %v1077_v43, %v1077_v43  ;;  %v3823_v43 = vld [vmem:[#allocation9 + $0x7a8] ss:$16 sps:$4 sm:$0xff]  }
 0x1bd   :  { %2735 = vmatpush1.bf16.msra.mxu0 %v3670_v15  ;;  %2899 = vmatpush1.bf16.msra.mxu1 %v3673_v16  ;;  %v1082_v15 = vpack.c.bf16 %v1074_v6, %v1074_v6  ;;  %v3742_v16 = vld [vmem:[#allocation9 + $0x600] ss:$16 sps:$4 sm:$0xff]   ;;  %v3817_v6 = vld [vmem:[#allocation9 + $0x788] ss:$16 sps:$4 sm:$0xff]  }
 0x1be   :  { %2736 = vmatprep.subr.bf16.mxu0 %v3678_v17  ;;  %2900 = vmatprep.subr.bf16.mxu1 %v3681_v18  ;;  %v3745_v17 = vld [vmem:[#allocation9 + $0x608] ss:$16 sps:$4 sm:$0xff]   ;;  %v3750_v18 = vld [vmem:[#allocation9 + $0x624] ss:$16 sps:$4 sm:$0xff]  }
 0x1c1   :  { %2737 = vmatpush1.bf16.msra.mxu0 %v3676_v19  ;;  %2901 = vmatpush1.bf16.msra.mxu1 %v3679_v20  ;;  %v3753_v19 = vld [vmem:[#allocation9 + $0x62c] ss:$16 sps:$4 sm:$0xff]   ;;  %v3748_v20 = vld [vmem:[#allocation9 + $0x620] ss:$16 sps:$4 sm:$0xff]  }
 0x1c2   :  { %2738 = vmatprep.subr.bf16.mxu0 %v3684_v21  ;;  %2902 = vmatprep.subr.bf16.mxu1 %v3687_v22  ;;  %v3751_v21 = vld [vmem:[#allocation9 + $0x628] ss:$16 sps:$4 sm:$0xff]   ;;  %v3756_v22 = vld [vmem:[#allocation9 + $0x644] ss:$16 sps:$4 sm:$0xff]  }
 0x1c5   :  { %2739 = vmatpush1.bf16.msra.mxu0 %v3682_v23  ;;  %2903 = vmatpush1.bf16.msra.mxu1 %v3685_v27  ;;  %v3759_v23 = vld [vmem:[#allocation9 + $0x64c] ss:$16 sps:$4 sm:$0xff]   ;;  %v3754_v27 = vld [vmem:[#allocation9 + $0x640] ss:$16 sps:$4 sm:$0xff]  }
 0x1c6   :  { %2740 = vmatprep.subr.bf16.mxu0 %v3690_v28  ;;  %2904 = vmatprep.subr.bf16.mxu1 %v3693_v29  ;;  %v3757_v28 = vld [vmem:[#allocation9 + $0x648] ss:$16 sps:$4 sm:$0xff]   ;;  %v3762_v29 = vld [vmem:[#allocation9 + $0x664] ss:$16 sps:$4 sm:$0xff]  }
 0x1c9   :  { %2741 = vmatpush1.bf16.msra.mxu0 %v3688_v30  ;;  %2905 = vmatpush1.bf16.msra.mxu1 %v3691_v3  ;;  %v3765_v30 = vld [vmem:[#allocation9 + $0x66c] ss:$16 sps:$4 sm:$0xff]   ;;  %v3760_v3 = vld [vmem:[#allocation9 + $0x660] ss:$16 sps:$4 sm:$0xff]  }
 0x1ca   :  { %2742 = vmatprep.subr.bf16.mxu0 %v3696_v31  ;;  %2906 = vmatprep.subr.bf16.mxu1 %v3699_v32  ;;  %v3763_v31 = vld [vmem:[#allocation9 + $0x668] ss:$16 sps:$4 sm:$0xff]   ;;  %v3768_v32 = vld [vmem:[#allocation9 + $0x684] ss:$16 sps:$4 sm:$0xff]  }
 0x1cd   :  { %2743 = vmatpush1.bf16.msra.mxu0 %v3694_v33  ;;  %2907 = vmatpush1.bf16.msra.mxu1 %v3697_v34  ;;  %v3771_v33 = vld [vmem:[#allocation9 + $0x68c] ss:$16 sps:$4 sm:$0xff]   ;;  %v3766_v34 = vld [vmem:[#allocation9 + $0x680] ss:$16 sps:$4 sm:$0xff]  }
 0x1ce   :  { %2744 = vmatprep.subr.bf16.mxu0 %v3702_v35  ;;  %2908 = vmatprep.subr.bf16.mxu1 %v3705_v36  ;;  %v3769_v35 = vld [vmem:[#allocation9 + $0x688] ss:$16 sps:$4 sm:$0xff]   ;;  %v3774_v36 = vld [vmem:[#allocation9 + $0x6a4] ss:$16 sps:$4 sm:$0xff]  }
 0x1d1   :  { %2745 = vmatpush1.bf16.msra.mxu0 %v3700_v38  ;;  %2909 = vmatpush1.bf16.msra.mxu1 %v3703_v39  ;;  %v3777_v38 = vld [vmem:[#allocation9 + $0x6ac] ss:$16 sps:$4 sm:$0xff]   ;;  %v3772_v39 = vld [vmem:[#allocation9 + $0x6a0] ss:$16 sps:$4 sm:$0xff]  }
 0x1d2   :  { %2746 = vmatprep.subr.bf16.mxu0 %v3708_v40  ;;  %2910 = vmatprep.subr.bf16.mxu1 %v3711_v41  ;;  %v3775_v40 = vld [vmem:[#allocation9 + $0x6a8] ss:$16 sps:$4 sm:$0xff]   ;;  %v3780_v41 = vld [vmem:[#allocation9 + $0x6c4] ss:$16 sps:$4 sm:$0xff]  }
 0x1d5   :  { %2747 = vmatpush1.bf16.msra.mxu0 %v3706_v42  ;;  %2911 = vmatpush1.bf16.msra.mxu1 %v3709_v44  ;;  %v3783_v42 = vld [vmem:[#allocation9 + $0x6cc] ss:$16 sps:$4 sm:$0xff]   ;;  %v3778_v44 = vld [vmem:[#allocation9 + $0x6c0] ss:$16 sps:$4 sm:$0xff]  }
 0x1d6   :  { %2748 = vmatprep.subr.bf16.mxu0 %v3714_v45  ;;  %2912 = vmatprep.subr.bf16.mxu1 %v3717_v46  ;;  %v3781_v45 = vld [vmem:[#allocation9 + $0x6c8] ss:$16 sps:$4 sm:$0xff]   ;;  %v3786_v46 = vld [vmem:[#allocation9 + $0x6e4] ss:$16 sps:$4 sm:$0xff]  }
 0x1d9   :  { %2749 = vmatpush1.bf16.msra.mxu0 %v3712_v47  ;;  %2913 = vmatpush1.bf16.msra.mxu1 %v3715_v48  ;;  %v3789_v47 = vld [vmem:[#allocation9 + $0x6ec] ss:$16 sps:$4 sm:$0xff]   ;;  %v3784_v48 = vld [vmem:[#allocation9 + $0x6e0] ss:$16 sps:$4 sm:$0xff]  }
 0x1da   :  { %2750 = vmatprep.subr.bf16.mxu0 %v3720_v37  ;;  %2914 = vmatprep.subr.bf16.mxu1 %v3723_v49  ;;  %v3787_v37 = vld [vmem:[#allocation9 + $0x6e8] ss:$16 sps:$4 sm:$0xff]   ;;  %v3792_v49 = vld [vmem:[#allocation9 + $0x704] ss:$16 sps:$4 sm:$0xff]  }
 0x1dd   :  { %2751 = vmatpush1.bf16.msra.mxu0 %v3718_v24  ;;  %2915 = vmatpush1.bf16.msra.mxu1 %v3721_v51  ;;  %v3790_v24 = vld [vmem:[#allocation9 + $0x700] ss:$16 sps:$4 sm:$0xff]   ;;  %v3793_v51 = vld [vmem:[#allocation9 + $0x708] ss:$16 sps:$4 sm:$0xff]  }
 0x1de   :  { %2752 = vmatprep.subr.bf16.mxu0 %v3726_v52  ;;  %2916 = vmatprep.subr.bf16.mxu1 %v3729_v53  ;;  %v3798_v52 = vld [vmem:[#allocation9 + $0x724] ss:$16 sps:$4 sm:$0xff]   ;;  %v3801_v53 = vld [vmem:[#allocation9 + $0x72c] ss:$16 sps:$4 sm:$0xff]  }
 0x1e1   :  { %2753 = vmatpush1.bf16.msra.mxu0 %v3724_v56  ;;  %2917 = vmatpush1.bf16.msra.mxu1 %v3727_v57  ;;  %v3804_v56 = vld [vmem:[#allocation9 + $0x744] ss:$16 sps:$4 sm:$0xff]   ;;  %v3807_v57 = vld [vmem:[#allocation9 + $0x74c] ss:$16 sps:$4 sm:$0xff]  }
 0x1e2   :  { %2754 = vmatprep.subr.bf16.mxu0 %v3732_v58  ;;  %2918 = vmatprep.subr.bf16.mxu1 %v3735_v59  ;;  %v3802_v58 = vld [vmem:[#allocation9 + $0x740] ss:$16 sps:$4 sm:$0xff]   ;;  %v3805_v59 = vld [vmem:[#allocation9 + $0x748] ss:$16 sps:$4 sm:$0xff]  }
 0x1e5   :  { %2755 = vmatpush1.bf16.msra.mxu0 %v3730_v0  ;;  %2919 = vmatpush1.bf16.msra.mxu1 %v3733_v1  ;;  %v3808_v0 = vld [vmem:[#allocation9 + $0x760] ss:$16 sps:$4 sm:$0xff]   ;;  %v3811_v1 = vld [vmem:[#allocation9 + $0x768] ss:$16 sps:$4 sm:$0xff]  }
 0x1e6   :  { %2756 = vmatprep.subr.bf16.mxu0 %v3738_v2  ;;  %2920 = vmatprep.subr.bf16.mxu1 %v3741_v4  ;;  %v3816_v2 = vld [vmem:[#allocation9 + $0x784] ss:$16 sps:$4 sm:$0xff]   ;;  %v3819_v4 = vld [vmem:[#allocation9 + $0x78c] ss:$16 sps:$4 sm:$0xff]  }
 0x1e9   :  { %2757 = vmatpush1.bf16.msra.mxu0 %v3736_v7  ;;  %2921 = vmatpush1.bf16.msra.mxu1 %v3739_v8  ;;  %v245_v7 = vsub.s32 6, %v4048_v11  ;;  %v3822_v8 = vld [vmem:[#allocation9 + $0x7a4] ss:$16 sps:$4 sm:$0xff]  }
 0x1ea   :  { %2767 = vmatprep.subr.bf16.mxu0 %v3744_v9  ;;  %2931 = vmatprep.subr.bf16.mxu1 %v3747_v10  ;;  %v3825_v9 = vld [vmem:[#allocation9 + $0x7ac] ss:$16 sps:$4 sm:$0xff]   ;;  %v3820_v10 = vld [vmem:[#allocation9 + $0x7a0] ss:$16 sps:$4 sm:$0xff]  }
 0x1ec   :  { %2759 = vmatmul.mubr.bf16.vlgmr.msra.gmra.mrb[8].mxu0 %v1082_v15  ;;  %2923 = vmatmul.mubr.bf16.vlgmr.msra.gmra.mrb[8].mxu1 %v1082_v15  ;;  %v246_v15 = vrot.slane %v4056_v13, %v245_v7 }
 0x1ed   :  { %2768 = vmatpush1.bf16.msra.mxu0 %v3742_v16  ;;  %2932 = vmatpush1.bf16.msra.mxu1 %v3745_v17  ;;  %v3828_v16 = vld [vmem:[#allocation9 + $0x7c4] ss:$16 sps:$4 sm:$0xff]   ;;  %v3831_v17 = vld [vmem:[#allocation9 + $0x7cc] ss:$16 sps:$4 sm:$0xff]  }
 0x1ee   :  { %2769 = vmatprep.subr.bf16.mxu0 %v3750_v18  ;;  %2933 = vmatprep.subr.bf16.mxu1 %v3753_v19  ;;  %v3826_v18 = vld [vmem:[#allocation9 + $0x7c0] ss:$16 sps:$4 sm:$0xff]   ;;  %v3829_v19 = vld [vmem:[#allocation9 + $0x7c8] ss:$16 sps:$4 sm:$0xff]   ;;  %v1064_v11 = vadd.f32 %v4082_v62, %v246_v15 }
 0x1ef   :  { %2799 = vmatprep.mubr.bf16.mxu0 %v1085_v63  ;;  %2963 = vmatprep.mubr.bf16.mxu1 %v1085_v63  ;;  %v3834_v63 = vld [vmem:[#allocation9 + $0x7e4] ss:$16 sps:$4 sm:$0xff]   ;;  %v1342_v62 = vld [vmem:[%s4117_s5] sm:$0xf] }
 0x1f1   :  { %2770 = vmatpush1.bf16.msra.mxu0 %v3748_v20  ;;  %2934 = vmatpush1.bf16.msra.mxu1 %v3751_v21  ;;  %v3837_v20 = vld [vmem:[#allocation9 + $0x7ec] ss:$16 sps:$4 sm:$0xff]   ;;  %v3832_v21 = vld [vmem:[#allocation9 + $0x7e0] ss:$16 sps:$4 sm:$0xff]  }
 0x1f2   :  { %2771 = vmatprep.subr.bf16.mxu0 %v3756_v22  ;;  %2935 = vmatprep.subr.bf16.mxu1 %v3759_v23  ;;  %v3835_v22 = vld [vmem:[#allocation9 + $0x7e8] ss:$16 sps:$4 sm:$0xff]   ;;  %v1076_v23 = vmax.f32 %v1064_v11, 0.0 }
 0x1f4   :  { %v1084_v13 = vpack.c.bf16 %v1076_v23, %v1076_v23 }
 0x1f5   :  { %2772 = vmatpush1.bf16.msra.mxu0 %v3754_v27  ;;  %2936 = vmatpush1.bf16.msra.mxu1 %v3757_v28  ;;  %v1347_v27 = vrot.slane %v1342_v62, %v4051_v12  ;;  %v1355_v28 = vrot.slane %v1342_v62, %v4073_v25 }
 0x1f6   :  { %2773 = vmatprep.subr.bf16.mxu0 %v3762_v29  ;;  %2937 = vmatprep.subr.bf16.mxu1 %v3765_v30  ;;  %v2976_v29 = vld [vmem:[%s4118_s6] sm:$0xf]  ;;  %v1351_v30 = vrot.slane %v1342_v62, %v4059_v14 }
 0x1f9   :  { %2774 = vmatpush1.bf16.msra.mxu0 %v3760_v3  ;;  %2938 = vmatpush1.bf16.msra.mxu1 %v3763_v31  ;;  %v1359_v3 = vrot.slane %v1342_v62, %v4066_v26 }
 0x1fa   :  { %2775 = vmatprep.subr.bf16.mxu0 %v3768_v32  ;;  %2939 = vmatprep.subr.bf16.mxu1 %v3771_v33 }
 0x1fd   :  { %2776 = vmatpush1.bf16.msra.mxu0 %v3766_v34  ;;  %2940 = vmatpush1.bf16.msra.mxu1 %v3769_v35  ;;  %v2981_v34 = vrot.slane %v2976_v29, %v4051_v12  ;;  %v2993_v12 = vrot.slane %v2976_v29, %v4066_v26 }
 0x1fe   :  { %2777 = vmatprep.subr.bf16.mxu0 %v3774_v36  ;;  %2941 = vmatprep.subr.bf16.mxu1 %v3777_v38 }
 0x201   :  { %2778 = vmatpush1.bf16.msra.mxu0 %v3772_v39  ;;  %2942 = vmatpush1.bf16.msra.mxu1 %v3775_v40  ;;  %v2985_v40 = vrot.slane %v2976_v29, %v4059_v14 }
 0x202   :  { %2779 = vmatprep.subr.bf16.mxu0 %v3780_v41  ;;  %2943 = vmatprep.subr.bf16.mxu1 %v3783_v42 }
 0x205   :  { %2780 = vmatpush1.bf16.msra.mxu0 %v3778_v44  ;;  %2944 = vmatpush1.bf16.msra.mxu1 %v3781_v45 }
 0x206   :  { %2781 = vmatprep.subr.bf16.mxu0 %v3786_v46  ;;  %2945 = vmatprep.subr.bf16.mxu1 %v3789_v47 }
 0x209   :  { %2782 = vmatpush1.bf16.msra.mxu0 %v3784_v48  ;;  %2946 = vmatpush1.bf16.msra.mxu1 %v3787_v37  ;;  %v2989_v37 = vrot.slane %v2976_v29, %v4073_v25 }
 0x20a   :  { %2783 = vmatprep.subr.bf16.mxu0 %v3792_v49  ;;  %2947 = vmatprep.subr.bf16.mxu1 %v3795_v50 }
 0x20d   :  { %2784 = vmatpush1.bf16.msra.mxu0 %v3790_v24  ;;  %2948 = vmatpush1.bf16.msra.mxu1 %v3793_v51 }
 0x20e   :  { %2785 = vmatprep.subr.bf16.mxu0 %v3798_v52  ;;  %2949 = vmatprep.subr.bf16.mxu1 %v3801_v53 }
 0x211   :  { %2786 = vmatpush1.bf16.msra.mxu0 %v3796_v54  ;;  %2950 = vmatpush1.bf16.msra.mxu1 %v3799_v55 }
 0x212   :  { %2787 = vmatprep.subr.bf16.mxu0 %v3804_v56  ;;  %2951 = vmatprep.subr.bf16.mxu1 %v3807_v57  ;;  %v3410_v56 = vld [vmem:[#allocation3] ss:$0 sm:$0xff] }
 0x215   :  { %2788 = vmatpush1.bf16.msra.mxu0 %v3802_v58  ;;  %2952 = vmatpush1.bf16.msra.mxu1 %v3805_v59 }
 0x216   :  { %2789 = vmatprep.subr.bf16.mxu0 %v3810_v60  ;;  %2953 = vmatprep.subr.bf16.mxu1 %v3813_v61 }
 0x219   :  { %2790 = vmatpush1.bf16.msra.mxu0 %v3808_v0  ;;  %2954 = vmatpush1.bf16.msra.mxu1 %v3811_v1 }
 0x21a   :  { %2791 = vmatprep.subr.bf16.mxu0 %v3816_v2  ;;  %2955 = vmatprep.subr.bf16.mxu1 %v3819_v4 }
 0x21d   :  { %2792 = vmatpush1.bf16.msra.mxu0 %v3814_v5  ;;  %2956 = vmatpush1.bf16.msra.mxu1 %v3817_v6 }
 0x21e   :  { %2793 = vmatprep.subr.bf16.mxu0 %v3822_v8  ;;  %2957 = vmatprep.subr.bf16.mxu1 %v3825_v9 }
 0x221   :  { %2794 = vmatpush1.bf16.msra.mxu0 %v3820_v10  ;;  %2958 = vmatpush1.bf16.msra.mxu1 %v3823_v43 }
 0x222   :  { %2795 = vmatprep.subr.bf16.mxu0 %v3828_v16  ;;  %2959 = vmatprep.subr.bf16.mxu1 %v3831_v17 }
 0x225   :  { %2796 = vmatpush1.bf16.msra.mxu0 %v3826_v18  ;;  %2960 = vmatpush1.bf16.msra.mxu1 %v3829_v19 }
 0x226   :  { %2797 = vmatprep.subr.bf16.mxu0 %v3834_v63  ;;  %2961 = vmatprep.subr.bf16.mxu1 %v3837_v20 }
 0x229   :  { %2798 = vmatpush1.bf16.msra.mxu0 %v3832_v21  ;;  %2962 = vmatpush1.bf16.msra.mxu1 %v3835_v22 }
 0x22c   :  { %2800 = vmatmul.mubr.bf16.vlgmr.msra.gmra.mrb[8].mxu0 %v1084_v13  ;;  %2964 = vmatmul.mubr.bf16.vlgmr.msra.gmra.mrb[8].mxu1 %v1084_v13 }
 0x2ff   :  { %v2801_v31 = vpop.f32.mrb[8].mxu0  ;;  %v2965_v32 = vpop.f32.mrb[8].mxu1 }
 0x300   :  { %v3418_v33 = vadd.f32 %v2801_v31, %v1347_v27  ;;  %v3420_v35 = vadd.f32 %v2965_v32, %v1355_v28  ;;  %v2803_v36 = vpop.f32.mrb[9].mxu0  ;;  %v2967_v38 = vpop.f32.mrb[9].mxu1 }
 0x301   :  { %v3419_v39 = vadd.f32 %v2803_v36, %v1351_v30  ;;  %v3421_v41 = vadd.f32 %v2967_v38, %v1359_v3  ;;  %v2805_v42 = vpop.f32.mrb[10].mxu0  ;;  %v2969_v44 = vpop.f32.mrb[10].mxu1 }
 0x302   :  { %v2972_v45 = vmax.f32 %v3418_v33, 0.0  ;;  %v2806_v46 = vpop.f32.mrb[11].mxu0  ;;  %v2970_v47 = vpop.f32.mrb[11].mxu1  ;;  %v2974_v48 = vmax.f32 %v3420_v35, 0.0 }
 0x303   :  { %v2973_v49 = vmax.f32 %v3419_v39, 0.0  ;;  %v2975_v51 = vmax.f32 %v3421_v41, 0.0 }
 0x304   :  { %v2998_v50 = vmul.f32 %v2981_v34, %v2972_v45  ;;  %v3000_v52 = vmul.f32 %v2989_v37, %v2974_v48 }
 0x305   :  { %v2999_v24 = vmul.f32 %v2985_v40, %v2973_v49  ;;  %v3001_v54 = vmul.f32 %v2993_v12, %v2975_v51 }
 0x307   :  { %v3002_v53 = vadd.f32 %v2999_v24, %v2998_v50 }
 0x309   :  { %v3003_v55 = vadd.f32 %v3002_v53, %v3000_v52 }
 0x30b   :  { %v3004_v14 = vadd.f32 %v3003_v55, %v3001_v54 }
 0x30d   :  { %3005 = vadd.xlane.f32.xlu0 %v3004_v14 }
 0x39a   :  { %v3006_v57 = vpop.xlane.xlu0 %3005 }
 0x39b   :  { %v3014_v58 = vadd.f32 %v3410_v56, %v3006_v57 }
 0x39d   :  { %3016 = vst.msk [vmem:[%s4120_s8] sm:$0xff] %vm3015_vm0, %v3014_v58 }
 0x39e   :  { %3021 = vsyncpa [#allocation5], 1 }
 0x39f   :  { %3022 = vsyncpa [#allocation7], 1 }
 0x3a0   :  { %3023 = vsyncpa [#allocation10], 1 }

</bundles_post_ra>
